<compile_context>
chip_gen: v5e
topology: v5e:2x2
jax: 0.10.0
libtpu: 0.0.40
codegen_flags: <defaults>
</compile_context>

<pallas_src>
import functools

import numpy as np
import jax
import jax.numpy as jnp
from jax.experimental import pallas as pl
from jax.experimental.pallas import tpu as pltpu


def _round_up(x: int, m: int) -> int:
    return ((x + m - 1) // m) * m


# ------------------------------------------------------------------
# Kernels (transposed, lane-dense layout: blocks are (features, tile_n))
# ------------------------------------------------------------------
def _nerf_kernel_t(freq_ref, x_ref, o_ref, *, num_freqs, include_input, d_in):
    """covs=None path.  freq_ref: (F, 1); x_ref: (D, tn); o_ref: (out_dim, tn)."""
    F = num_freqs
    DF = d_in * F
    fcol = freq_ref[...]                                            # (F, 1)
    two_pi = 2.0 * np.pi
    half_pi = np.pi / 2.0
    for d in range(d_in):                                           # static, D is tiny
        xd = x_ref[d:d + 1, :]                                      # (1, tn)
        scaled = (two_pi * xd) * fcol                               # (F, tn) broadcast
        o_ref[d * F:(d + 1) * F, :] = jnp.sin(scaled).astype(o_ref.dtype)
        o_ref[DF + d * F:DF + (d + 1) * F, :] = jnp.sin(scaled + half_pi).astype(o_ref.dtype)
        if include_input:
            o_ref[2 * DF + d:2 * DF + d + 1, :] = ((xd - 0.5) * 2.0).astype(o_ref.dtype)


def _nerf_ipe_kernel_t(freq_ref, x_ref, var_ref, o_ref, *, num_freqs, include_input, d_in):
    """Integrated (mip-NeRF) path.  var_ref: (D, tn) variance diagonal."""
    F = num_freqs
    DF = d_in * F
    fcol = freq_ref[...]                                            # (F, 1)
    f2col = fcol * fcol                                             # (F, 1)
    two_pi = 2.0 * np.pi
    half_pi = np.pi / 2.0
    for d in range(d_in):
        xd = x_ref[d:d + 1, :]                                      # (1, tn)
        vd = var_ref[d:d + 1, :]                                    # (1, tn)
        scaled = (two_pi * xd) * fcol                               # (F, tn)
        amp = jnp.exp(-0.5 * (vd * f2col))                          # (F, tn), computed once
        o_ref[d * F:(d + 1) * F, :] = (amp * jnp.sin(scaled)).astype(o_ref.dtype)
        o_ref[DF + d * F:DF + (d + 1) * F, :] = (amp * jnp.sin(scaled + half_pi)).astype(o_ref.dtype)
        if include_input:
            o_ref[2 * DF + d:2 * DF + d + 1, :] = ((xd - 0.5) * 2.0).astype(o_ref.dtype)


# ------------------------------------------------------------------
# Wrapper
# ------------------------------------------------------------------
class NeRFEncodingPallas:
    def __init__(self, in_dim, num_frequencies, min_freq_exp, max_freq_exp,
                 include_input=False, out_dtype=jnp.float32):
        self.in_dim = int(in_dim)
        self.num_frequencies = int(num_frequencies)
        self.min_freq = float(min_freq_exp)
        self.max_freq = float(max_freq_exp)
        self.include_input = bool(include_input)
        self.out_dtype = out_dtype
        # Exact 2 ** linspace frequencies (computed host-side, passed as a tiny VMEM input).
        self.freqs = (2.0 ** np.linspace(self.min_freq, self.max_freq,
                                         self.num_frequencies)).astype(np.float32)

    def get_out_dim(self):
        out = self.in_dim * self.num_frequencies * 2
        if self.include_input:
            out += self.in_dim
        return out

    def _tiling(self, n, tile_n_max):
        n128 = _round_up(max(n, 1), 128)
        tile = _round_up(min(int(tile_n_max), n128), 128)
        # keep the grid >= 2 so v7x's two TensorCores both get work (when N is big enough)
        if n128 // tile < 2 and n128 >= 256:
            tile = _round_up(-(-n128 // 2), 128)
        n_pad = _round_up(n, tile)
        return tile, n_pad

    def __call__(self, in_tensor, covs=None, *, tile_n=8192):
        D, F = self.in_dim, self.num_frequencies
        out_dim = self.get_out_dim()
        batch_shape = in_tensor.shape[:-1]
        assert in_tensor.shape[-1] == D

        x2d = jnp.reshape(in_tensor, (-1, D)).astype(jnp.float32)
        N = x2d.shape[0]
        tile, n_pad = self._tiling(N, tile_n)
        grid = (n_pad // tile,)

        # Lane-dense transposed layout: samples on the 128-lane axis.
        x_t = x2d.T
        if n_pad != N:
            x_t = jnp.pad(x_t, ((0, 0), (0, n_pad - N)))

        freqs_col = jnp.asarray(self.freqs, jnp.float32).reshape(F, 1)

        freq_spec = pl.BlockSpec((F, 1), lambda i: (0, 0))          # full (tiny) array
        feat_spec = pl.BlockSpec((D, tile), lambda i: (0, i))
        o_spec = pl.BlockSpec((out_dim, tile), lambda i: (0, i))
        out_shape = jax.ShapeDtypeStruct((out_dim, n_pad), self.out_dtype)
        cparams = pltpu.CompilerParams(dimension_semantics=("parallel",))

        if covs is None:
            kernel = functools.partial(_nerf_kernel_t, num_freqs=F,
                                       include_input=self.include_input, d_in=D)
            out_t = pl.pallas_call(
                kernel,
                out_shape=out_shape,
                grid=grid,
                in_specs=[freq_spec, feat_spec],
                out_specs=o_spec,
                compiler_params=cparams,
            )(freqs_col, x_t)
        else:
            # Accept either full covariances (..., D, D) or the variance diagonal (..., D).
            if covs.ndim == in_tensor.ndim + 1:
                var = jnp.diagonal(covs, axis1=-2, axis2=-1)
            else:
                var = covs
            var_t = jnp.reshape(var, (-1, D)).astype(jnp.float32).T
            if n_pad != N:
                var_t = jnp.pad(var_t, ((0, 0), (0, n_pad - N)))
            kernel = functools.partial(_nerf_ipe_kernel_t, num_freqs=F,
                                       include_input=self.include_input, d_in=D)
            out_t = pl.pallas_call(
                kernel,
                out_shape=out_shape,
                grid=grid,
                in_specs=[freq_spec, feat_spec, feat_spec],
                out_specs=o_spec,
                compiler_params=cparams,
            )(freqs_col, x_t, var_t)

        out = out_t[:, :N].T                     # wrapper-side layout plumbing
        return jnp.reshape(out, (*batch_shape, out_dim))


# ------------------------------------------------------------------
# Pure-JAX reference (mirrors the PyTorch forward) for a correctness check
# ------------------------------------------------------------------
def _reference(x, freqs, include_input, covs=None):
    freqs = jnp.asarray(freqs, jnp.float32)
    original = (x - 0.5) * 2.0
    x2 = 2.0 * jnp.pi * x
    scaled = (x2[..., None] * freqs).reshape(*x.shape[:-1], -1)
    if covs is None:
        enc = jnp.sin(jnp.concatenate([scaled, scaled + jnp.pi / 2.0], axis=-1))
    else:
        dvar = jnp.diagonal(covs, axis1=-2, axis2=-1)[..., :, None] * freqs[None, :] ** 2
        dvar = dvar.reshape(*dvar.shape[:-2], -1)
        means = jnp.concatenate([scaled, scaled + jnp.pi / 2.0], axis=-1)
        varis = jnp.concatenate([dvar, dvar], axis=-1)
        enc = jnp.exp(-0.5 * varis) * jnp.sin(means)
    if include_input:
        enc = jnp.concatenate([enc, original], axis=-1)
    return enc


if __name__ == "__main__":
    key = jax.random.PRNGKey(0)
    N, D, F = 512, 3, 6
    min_freq, max_freq = 0.0, 5.0
    include_input = True

    k1, k2 = jax.random.split(key)
    x = jax.random.uniform(k1, (N, D), dtype=jnp.float32)            # in [0, 1]
    a = jax.random.normal(k2, (N, D, D), dtype=jnp.float32) * 0.05
    covs = jnp.einsum("nij,nkj->nik", a, a)                          # SPD covariances

    enc = NeRFEncodingPallas(D, F, min_freq, max_freq, include_input=include_input)

    # covs=None path
    out = jax.block_until_ready(enc(x))
    ref = _reference(x, enc.freqs, include_input)
    assert out.shape == (N, enc.get_out_dim())
    assert jnp.allclose(out, ref, atol=1e-4, rtol=1e-5), "mismatch (covs=None)"

    # integrated (mip-NeRF) path, full covariances
    out_ipe = jax.block_until_ready(enc(x, covs=covs))
    ref_ipe = _reference(x, enc.freqs, include_input, covs=covs)
    assert jnp.allclose(out_ipe, ref_ipe, atol=1e-4, rtol=1e-5), "mismatch (covs path)"

    # integrated path, variance diagonal passed directly (avoids wrapper diagonal traffic)
    diag = jnp.diagonal(covs, axis1=-2, axis2=-1)
    out_diag = jax.block_until_ready(enc(x, covs=diag))
    assert jnp.allclose(out_diag, ref_ipe, atol=1e-4, rtol=1e-5), "mismatch (diag path)"

    print("KERNEL_OK")
</pallas_src>

<mosaic_0001>
module attributes {stable_mosaic.version = 11 : i64} {
  func.func @_nerf_kernel_t(%arg0: i32, %arg1: memref<6x1xf32, #tpu.memory_space<vmem>>, %arg2: memref<3x256xf32, #tpu.memory_space<vmem>>, %arg3: memref<39x256xf32, #tpu.memory_space<vmem>>) attributes {dimension_semantics = [#tpu.dimension_semantics<parallel>], iteration_bounds = array<i64: 2>, scalar_prefetch = 0 : i64, scratch_operands = 0 : i64, tpu.core_type = #tpu.core_type<tc>, window_params = [{pipeline_mode = #tpu.pipeline_mode<synchronous>, transform_indices = @transform_0, window_bounds = array<i64: 6, 1>}, {transform_indices = @transform_1, window_bounds = array<i64: 3, 256>}, {transform_indices = @transform_2, window_bounds = array<i64: 39, 256>}]} {
    %c0 = arith.constant 0 : index
    %c0_0 = arith.constant 0 : index
    %0 = vector.load %arg1[%c0, %c0_0] : memref<6x1xf32, #tpu.memory_space<vmem>>, vector<6x1xf32>
    %c0_1 = arith.constant 0 : index
    %c0_2 = arith.constant 0 : index
    %1 = vector.load %arg2[%c0_1, %c0_2] : memref<3x256xf32, #tpu.memory_space<vmem>>, vector<1x256xf32>
    %cst = arith.constant 6.28318548 : f32
    %2 = vector.broadcast %cst : f32 to vector<1x256xf32>
    %3 = arith.mulf %2, %1 : vector<1x256xf32>
    %4 = vector.broadcast %3 : vector<1x256xf32> to vector<6x256xf32>
    %5 = vector.broadcast %0 : vector<6x1xf32> to vector<6x256xf32>
    %6 = arith.mulf %4, %5 : vector<6x256xf32>
    %7 = math.sin %6 : vector<6x256xf32>
    %c0_3 = arith.constant 0 : index
    %c0_4 = arith.constant 0 : index
    %8 = vector.load %arg3[%c0_3, %c0_4] : memref<39x256xf32, #tpu.memory_space<vmem>>, vector<6x256xf32>
    tpu.vector_store %arg3[%c0_3, %c0_4], %7 {strides = array<i32>} : memref<39x256xf32, #tpu.memory_space<vmem>>, vector<6x256xf32>,
    %cst_5 = arith.constant 1.57079637 : f32
    %9 = vector.broadcast %cst_5 : f32 to vector<6x256xf32>
    %10 = arith.addf %6, %9 : vector<6x256xf32>
    %11 = math.sin %10 : vector<6x256xf32>
    %c18 = arith.constant 18 : index
    %c0_6 = arith.constant 0 : index
    %12 = vector.load %arg3[%c18, %c0_6] : memref<39x256xf32, #tpu.memory_space<vmem>>, vector<6x256xf32>
    tpu.vector_store %arg3[%c18, %c0_6], %11 {strides = array<i32>} : memref<39x256xf32, #tpu.memory_space<vmem>>, vector<6x256xf32>,
    %cst_7 = arith.constant 5.000000e-01 : f32
    %13 = vector.broadcast %cst_7 : f32 to vector<1x256xf32>
    %14 = arith.subf %1, %13 : vector<1x256xf32>
    %cst_8 = arith.constant 2.000000e+00 : f32
    %15 = vector.broadcast %cst_8 : f32 to vector<1x256xf32>
    %16 = arith.mulf %14, %15 : vector<1x256xf32>
    %c36 = arith.constant 36 : index
    %c0_9 = arith.constant 0 : index
    %17 = vector.load %arg3[%c36, %c0_9] : memref<39x256xf32, #tpu.memory_space<vmem>>, vector<1x256xf32>
    tpu.vector_store %arg3[%c36, %c0_9], %16 {strides = array<i32>} : memref<39x256xf32, #tpu.memory_space<vmem>>, vector<1x256xf32>,
    %c1 = arith.constant 1 : index
    %c0_10 = arith.constant 0 : index
    %18 = vector.load %arg2[%c1, %c0_10] : memref<3x256xf32, #tpu.memory_space<vmem>>, vector<1x256xf32>
    %cst_11 = arith.constant 6.28318548 : f32
    %19 = vector.broadcast %cst_11 : f32 to vector<1x256xf32>
    %20 = arith.mulf %19, %18 : vector<1x256xf32>
    %21 = vector.broadcast %20 : vector<1x256xf32> to vector<6x256xf32>
    %22 = vector.broadcast %0 : vector<6x1xf32> to vector<6x256xf32>
    %23 = arith.mulf %21, %22 : vector<6x256xf32>
    %24 = math.sin %23 : vector<6x256xf32>
    %c6 = arith.constant 6 : index
    %c0_12 = arith.constant 0 : index
    %25 = vector.load %arg3[%c6, %c0_12] : memref<39x256xf32, #tpu.memory_space<vmem>>, vector<6x256xf32>
    tpu.vector_store %arg3[%c6, %c0_12], %24 {strides = array<i32>} : memref<39x256xf32, #tpu.memory_space<vmem>>, vector<6x256xf32>,
    %cst_13 = arith.constant 1.57079637 : f32
    %26 = vector.broadcast %cst_13 : f32 to vector<6x256xf32>
    %27 = arith.addf %23, %26 : vector<6x256xf32>
    %28 = math.sin %27 : vector<6x256xf32>
    %c24 = arith.constant 24 : index
    %c0_14 = arith.constant 0 : index
    %29 = vector.load %arg3[%c24, %c0_14] : memref<39x256xf32, #tpu.memory_space<vmem>>, vector<6x256xf32>
    tpu.vector_store %arg3[%c24, %c0_14], %28 {strides = array<i32>} : memref<39x256xf32, #tpu.memory_space<vmem>>, vector<6x256xf32>,
    %cst_15 = arith.constant 5.000000e-01 : f32
    %30 = vector.broadcast %cst_15 : f32 to vector<1x256xf32>
    %31 = arith.subf %18, %30 : vector<1x256xf32>
    %cst_16 = arith.constant 2.000000e+00 : f32
    %32 = vector.broadcast %cst_16 : f32 to vector<1x256xf32>
    %33 = arith.mulf %31, %32 : vector<1x256xf32>
    %c37 = arith.constant 37 : index
    %c0_17 = arith.constant 0 : index
    %34 = vector.load %arg3[%c37, %c0_17] : memref<39x256xf32, #tpu.memory_space<vmem>>, vector<1x256xf32>
    tpu.vector_store %arg3[%c37, %c0_17], %33 {strides = array<i32>} : memref<39x256xf32, #tpu.memory_space<vmem>>, vector<1x256xf32>,
    %c2 = arith.constant 2 : index
    %c0_18 = arith.constant 0 : index
    %35 = vector.load %arg2[%c2, %c0_18] : memref<3x256xf32, #tpu.memory_space<vmem>>, vector<1x256xf32>
    %cst_19 = arith.constant 6.28318548 : f32
    %36 = vector.broadcast %cst_19 : f32 to vector<1x256xf32>
    %37 = arith.mulf %36, %35 : vector<1x256xf32>
    %38 = vector.broadcast %37 : vector<1x256xf32> to vector<6x256xf32>
    %39 = vector.broadcast %0 : vector<6x1xf32> to vector<6x256xf32>
    %40 = arith.mulf %38, %39 : vector<6x256xf32>
    %41 = math.sin %40 : vector<6x256xf32>
    %c12 = arith.constant 12 : index
    %c0_20 = arith.constant 0 : index
    %42 = vector.load %arg3[%c12, %c0_20] : memref<39x256xf32, #tpu.memory_space<vmem>>, vector<6x256xf32>
    tpu.vector_store %arg3[%c12, %c0_20], %41 {strides = array<i32>} : memref<39x256xf32, #tpu.memory_space<vmem>>, vector<6x256xf32>,
    %cst_21 = arith.constant 1.57079637 : f32
    %43 = vector.broadcast %cst_21 : f32 to vector<6x256xf32>
    %44 = arith.addf %40, %43 : vector<6x256xf32>
    %45 = math.sin %44 : vector<6x256xf32>
    %c30 = arith.constant 30 : index
    %c0_22 = arith.constant 0 : index
    %46 = vector.load %arg3[%c30, %c0_22] : memref<39x256xf32, #tpu.memory_space<vmem>>, vector<6x256xf32>
    tpu.vector_store %arg3[%c30, %c0_22], %45 {strides = array<i32>} : memref<39x256xf32, #tpu.memory_space<vmem>>, vector<6x256xf32>,
    %cst_23 = arith.constant 5.000000e-01 : f32
    %47 = vector.broadcast %cst_23 : f32 to vector<1x256xf32>
    %48 = arith.subf %35, %47 : vector<1x256xf32>
    %cst_24 = arith.constant 2.000000e+00 : f32
    %49 = vector.broadcast %cst_24 : f32 to vector<1x256xf32>
    %50 = arith.mulf %48, %49 : vector<1x256xf32>
    %c38 = arith.constant 38 : index
    %c0_25 = arith.constant 0 : index
    %51 = vector.load %arg3[%c38, %c0_25] : memref<39x256xf32, #tpu.memory_space<vmem>>, vector<1x256xf32>
    tpu.vector_store %arg3[%c38, %c0_25], %50 {strides = array<i32>} : memref<39x256xf32, #tpu.memory_space<vmem>>, vector<1x256xf32>,
    return
  }
  func.func @transform_0(%arg0: i32) -> (i32, i32) {
    %c0_i32 = arith.constant 0 : i32
    %c0_i32_0 = arith.constant 0 : i32
    %c0_i32_1 = arith.constant 0 : i32
    return %c0_i32, %c0_i32_0 : i32, i32
  }
  func.func @transform_1(%arg0: i32) -> (i32, i32) {
    %c0_i32 = arith.constant 0 : i32
    %c0_i32_0 = arith.constant 0 : i32
    return %c0_i32, %arg0 : i32, i32
  }
  func.func @transform_2(%arg0: i32) -> (i32, i32) {
    %c0_i32 = arith.constant 0 : i32
    %c0_i32_0 = arith.constant 0 : i32
    return %c0_i32, %arg0 : i32, i32
  }
}

</mosaic_0001>

<bundles_post_ra>
// kernel: tpu_custom_call.1
= control target key start
LH: loop header
LB: loop body
LE: loop exit
PB: predicated region body
PF: predicated region fallthrough
CT: control target
= control target key end

     0   :  { %7 = vsyncpa [#allocation3], 0  ;;  %s3965_s0 = inlined_call_operand.vmem [shape: f32[6,1], index: 0, kind: input, shape index: {}]   ;;  %s3966_s1 = inlined_call_operand.hbm [shape: f32[3,512], index: 1, kind: input, shape index: {}]   ;;  %s3967_s2 = inlined_call_operand.hbm [shape: f32[39,512], index: 2, kind: output, shape index: {}]  }
   0x1   :  { %9 = vsyncpa [#allocation3 + $0x1], 0 }
   0x2   :  { %10 = vsyncpa [#allocation4], 0 }
   0x3   :  { %12 = vsyncpa [#allocation4 + $0x1], 0  ;;  %s2457_s9 = smov 0   ;;  %s2459_s10 = smov 0  }
   0x4   :  { %s2461_s11 = smov 0   ;;  %s2463_s12 = smov 0  }
   0x5 LB: > { %s2478_s13 = sadd.s32 4294967295, %s2430_s12   ;;  %s2215_s14 = sadd.s32 4294967294, %s2430_s12   ;;  %s2430_s12 = sphi %s2463_s12, %s3999_s12   ;;  %s2426_s11 = sphi %s2461_s11, %s3998_s11   ;;  %s2422_s10 = sphi %s2459_s10, %s3997_s10   ;;  %s2418_s9 = sphi %s2457_s9, %s3996_s9  }
   0x6   : > { %s2482_s15 = sadd.s32 1, %s2430_s12   ;;  %s46_s16 = sadd.s32 1, %s2426_s11 }
   0x7   : > { %s43_s17 = ssub.s32 %s2430_s12, %s2482_s15  ;;  %p53_p0 = scmp.ne.s32.totalorder %s2426_s11, %s2422_s10 }
   0x8   : > { %p44_p1 = scmp.eq.s32.totalorder %s43_s17, 0  ;;  %p54_p2 = scmp.eq.s32.totalorder %s2430_s12, 0 }
   0x9   : > { %p59_p3 = scmp.ne.s32.totalorder %s2422_s10, %s2418_s9  ;;  %p60_p4 = scmp.eq.s32.totalorder %s2478_s13, 0 }
   0xa   : > { %s2494_s18 = scalar_select %p44_p1, %s2426_s11, %s46_s16  }
   0xb   : > { %p2496_p5 = por %p54_p2, %p53_p0  ;;  %p2500_p6 = por %p60_p4, %p59_p3 }
   0xc   : > { %p83_p7 = scmp.eq.s32.totalorder %s2478_s13, 1  ;;  %p89_p8 = scmp.eq.s32.totalorder %s2215_s14, 1 }
   0xd   : > { %p2286_p10 = scmp.lt.s32.totalorder %s2430_s12, 2  ;;  %s112_s23 = sand.u32 1, %s2426_s11  }
   0xe   : > { %p2507_p11 = por %p83_p7, %p53_p0  ;;  %p2511_p12 = por %p89_p8, %p59_p3 }
   0xf   : > { %s2271_s24 = sshll.u32 %s2430_s12, 3  ;;  %s2218_s25 = sshll.u32 %s112_s23, 3 }
  0x10   : > { %s121_s28 = scalar_lea.hbm %s3966_s1, %s2271_s24  ;;  %s116_s30 = scalar_lea.vmem [#allocation2], %s2218_s25 }
  0x11   : > { %s123_s29 = sshll.u32 %s121_s28, 4  ;;  %s125_s3 = sshll.u32 %s116_s30, 4  ;;  %s124_s29 = int_to_ptr.hbm [resolvable:$true] %s123_s29  ;;  %s126_s3 = int_to_ptr.vmem [resolvable:$true] %s125_s3 }
  0x12   : > { %p2522_p13 = pnand %p2286_p10, %p2496_p5  ;;  %p2221_p0 = scmp.ge.s32.totalorder %s2430_s12, 1 }
  0x13   : > { %p130_p1 = scmp.lt.s32.totalorder %s2430_s12, 3  ;;  %s113_s5 = scalar_lea.sflag [#allocation3], %s112_s23 }
  0x14   : > { %s2334_s6 = sshra.s32 %s124_s29, 4  ;;  %p2338_p3 = pneg %p2522_p13  ;;  %s2335_s6 = int_to_ptr.hbm [resolvable:$true] %s2334_s6 }
  0x15   : > { %s2336_s7 = scalar_lea.hbm %s2335_s6, 8  ;;  %s2341_s16 = scalar_lea.hbm %s3966_s1, 16 }
  0x16   : > { %p2337_p2 = scmp.ne.s32.totalorder %s2335_s6, %s2336_s7  ;;  %p2342_p5 = scmp.lt.s32.totalorder %s2335_s6, %s3966_s1 }
  0x17   : > { %p2343_p8 = scmp.lt.s32.totalorder %s2341_s16, %s2336_s7 }
  0x18   : > { %p2339_p4 = pnand %p2338_p3, %p2337_p2 }
  0x19   : > { %p2344_p10 = por %p2343_p8, %p2342_p5 }
  0x1a   : > { %p2340_p7 = pneg %p2339_p4 }
  0x1c   : > { %p2345_p9 = pnand %p2344_p10, %p2340_p7 }
  0x1e   : > { %2348 = shalt.err (!%p2345_p9)
}
  0x1f   : > { %2281 = dma.hbm_to_vmem [thread:$0]  (!%p2522_p13), %s124_s29, 128, %s126_s3, %s113_s5  }
  0x20   : > { %p131_p2 = pnand %p2221_p0, %p130_p1 }
  0x21   : > { %s2543_s23 = sand.u32 (!%p131_p2), 1, %s2422_s10  }
  0x22   : > { %134 = sbr.rel (%p131_p2) target bundleno = 661 (0x295), region = 28  ;;  %s2222_s24 = sshll.u32 (!%p131_p2), %s2543_s23, 3 }
  0x23   : > { %s137_s25 = scalar_lea.sflag (!%p131_p2), [#allocation3], %s2543_s23  ;;  %s2547_s26 = scalar_lea.vmem (!%p131_p2), [#allocation2], %s2222_s24 }
  0x27   : > { %2409 = dma.done.wait (%p2500_p6), %s137_s25, 128  }
  0x28   : > { %2411 = vsyncadd (%p2500_p6), %s137_s25, 4294967168  ;;  %v2432_v0 = vmov 0   ;;  %v164_v1 = vld [vmem:[%s3965_s0] sm:$0x3f]  ;;  %v2433_v35 = vmov 683565275  }
  0x29   : > { %2330 = vset.pattern.permute.xlu0 %v2432_v0  ;;  %v165_v2 = vld [vmem:[%s2547_s26] ss:$4 sm:$0x3]  ;;  %v2434_v37 = vmov 2475754826   ;;  %s2273_s20 = smul.u32 80, %s2543_s23 }
  0x2a   : > { %174 = vperm.xlu0 %2330, %v164_v1   ;;  %v166_v3 = vmul.f32 6.2831855, %v165_v2  ;;  %v2435_v41 = vmov 2131351028   ;;  %v2436_v44 = vmov 2102212464  }
  0x2b   : > { %v2437_v47 = vmov 920167782   ;;  %v2438_v50 = vmov 1326507024   ;;  %s2878_s29 = scalar_lea.vmem [#allocation5], %s2273_s20  ;;  %s2272_s30 = sshll.u32 %s2478_s13, 4 }
  0x2c   : > { %v168_v4 = vperm.slane %v166_v3, 0  ;;  %v169_v5 = vperm.slane %v166_v3, 1  ;;  %s2138_s5 = scalar_lea.hbm %s3967_s2, %s2272_s30  ;;  %s2139_s6 = sshll.u32 %s2878_s29, 4  ;;  %s2140_s6 = int_to_ptr.vmem [resolvable:$true] %s2139_s6 }
  0x2d   : > { %s2141_s7 = sshll.u32 %s2138_s5, 4  ;;  %s2127_s13 = scalar_lea.sflag [#allocation4], %s2543_s23  ;;  %s2142_s7 = int_to_ptr.hbm [resolvable:$true] %s2141_s7 }
  0x2e   : > { %s2378_s8 = sshra.s32 %s2142_s7, 4  ;;  %s2384_s19 = scalar_lea.hbm %s3967_s2, 160  ;;  %s2379_s8 = int_to_ptr.hbm [resolvable:$true] %s2378_s8 }
  0x2f   : > { %s2380_s14 = scalar_lea.hbm %s2379_s8, 80  ;;  %p2385_p0 = scmp.lt.s32.totalorder %s2379_s8, %s3967_s2 }
  0x30   : > { %p2381_p6 = scmp.ne.s32.totalorder %s2379_s8, %s2380_s14  ;;  %p2386_p1 = scmp.lt.s32.totalorder %s2384_s19, %s2380_s14 }
  0x32   : > { %p2382_p9 = pnand %p2381_p6, %p2507_p11  ;;  %p2387_p3 = por %p2386_p1, %p2385_p0 }
  0x34   : > { %p2383_p13 = pneg %p2382_p9 }
  0x36   : > { %p2388_p4 = pnand %p2387_p3, %p2383_p13 }
  0x9c   : > { %v2558_v6 = vpop.permute.xlu0 %174 }
  0x9d   : > { %v2561_v7 = vmul.f32 %v2558_v6, %v168_v4  ;;  %v2564_v8 = vmul.f32 %v2558_v6, %v169_v5 }
  0x9f   : > { %v179_v9 = vand.u32 2147483647, %v2561_v7  ;;  %v182_v10 = vand.u32 2139095040, %v2561_v7  ;;  %v334_v11 = vand.u32 2147483647, %v2564_v8  ;;  %v337_v12 = vand.u32 2139095040, %v2564_v8 }
  0xa0   : > { %v2575_v23 = vadd.f32 1.5707964, %v2561_v7 }
  0xa1   : > { %v183_v13 = vshrl.u32 %v182_v10, 23  ;;  %v186_v14 = vand.u32 8388607, %v179_v9  ;;  %v338_v15 = vshrl.u32 %v337_v12, 23  ;;  %v341_v16 = vand.u32 8388607, %v334_v11 }
  0xa2   : > { %v496_v29 = vand.u32 2139095040, %v2575_v23 }
  0xa3   : > { %v2223_v17 = vadd.s32 4294967169, %v183_v13  ;;  %v187_v18 = vor.u32 8388608, %v186_v14  ;;  %v2226_v19 = vadd.s32 4294967169, %v338_v15  ;;  %v342_v20 = vor.u32 8388608, %v341_v16 }
  0xa5   : > { %v189_v21 = vadd.s32 1, %v2223_v17  ;;  %v344_v22 = vadd.s32 1, %v2226_v19  ;;  %v2577_v24 = vshll.u32 %v187_v18, 8  ;;  %v2579_v26 = vshll.u32 %v342_v20, 8 }
  0xa7   : > { %vm190_vm0 = vcmp.gt.s32.totalorder %v189_v21, 0  ;;  %vm345_vm1 = vcmp.gt.s32.totalorder %v344_v22, 0  ;;  %v2583_v31 = vand.u32 65535, %v2577_v24  ;;  %v2586_v32 = vshrl.u32 %v2577_v24, 16 }
  0xa8   : > { %v191_v25 = vsel %vm190_vm0, %v189_v21, 0  ;;  %v346_v28 = vsel %vm345_vm1, %v344_v22, 0  ;;  %v2595_v39 = vand.u32 65535, %v2579_v26 }
  0xa9   : > { %v193_v27 = vand.u32 31, %v191_v25  ;;  %v2588_v33 = vand.u32 31, %v346_v28  ;;  %v2590_v34 = vshrl.u32 %v191_v25, 5  ;;  %v2637_v20 = vshrl.u32 %v346_v28, 5 }
  0xab   : > { %v194_v30 = vsub.s32 32, %v193_v27  ;;  %v196_v36 = vshll.u32 %v2433_v35, %v193_v27  ;;  %v199_v38 = vshll.u32 %v2434_v37, %v193_v27  ;;  %v202_v43 = vshll.u32 %v2435_v41, %v193_v27 }
  0xac   : > { %v205_v46 = vshll.u32 %v2436_v44, %v193_v27  ;;  %v208_v49 = vshll.u32 %v2437_v47, %v193_v27  ;;  %v2606_v55 = vsub.s32 32, %v2588_v33  ;;  %vm211_vm2 = vcmp.lt.s32.totalorder %v2590_v34, 1 }
  0xad   : > { %v197_v40 = vshrl.u32 %v2434_v37, %v194_v30  ;;  %v200_v42 = vshrl.u32 %v2435_v41, %v194_v30  ;;  %v203_v45 = vshrl.u32 %v2436_v44, %v194_v30  ;;  %v206_v48 = vshrl.u32 %v2437_v47, %v194_v30 }
  0xae   : > { %v209_v51 = vshrl.u32 %v2438_v50, %v194_v30  ;;  %vm212_vm3 = vcmp.lt.s32.totalorder %v2590_v34, 2  ;;  %v195_v58 = vshrl.u32 %v2433_v35, %v194_v30  ;;  %vm214_vm4 = vcmp.lt.s32.totalorder %v2590_v34, 4 }
  0xaf   : > { %v198_v52 = vor.u32 %v197_v40, %v196_v36  ;;  %v201_v53 = vor.u32 %v200_v42, %v199_v38  ;;  %v204_v54 = vor.u32 %v203_v45, %v202_v43  ;;  %v207_v56 = vor.u32 %v206_v48, %v205_v46 }
  0xb0   : > { %v210_v57 = vor.u32 %v209_v51, %v208_v49  ;;  %vm213_vm5 = vcmp.lt.s32.totalorder %v2590_v34, 3  ;;  %v351_v63 = vshll.u32 %v2433_v35, %v2588_v33  ;;  %v352_v4 = vshrl.u32 %v2434_v37, %v2606_v55 }
  0xb1   : > { %v219_v59 = vsel %vm211_vm2, %v198_v52, %v201_v53  ;;  %v223_v60 = vsel %vm211_vm2, %v201_v53, %v204_v54  ;;  %v220_v61 = vsel %vm214_vm4, %v207_v56, 920167782  ;;  %v216_v1 = vsel %vm214_vm4, %v204_v54, 2102212464 }
  0xb2   : > { %v224_v62 = vsel %vm214_vm4, %v210_v57, 1326507024  ;;  %v221_v2 = vsel %vm213_vm5, %v204_v54, %v220_v61  ;;  %v354_v12 = vshll.u32 %v2434_v37, %v2588_v33  ;;  %v355_v13 = vshrl.u32 %v2435_v41, %v2606_v55 }
  0xb3   : > { %v225_v3 = vsel %vm213_vm5, %v207_v56, %v224_v62  ;;  %v222_v5 = vsel %vm212_vm3, %v219_v59, %v221_v2  ;;  %v215_v18 = vsel %vm211_vm2, %v195_v58, %v198_v52  ;;  %v217_v19 = vsel %vm213_vm5, %v201_v53, %v216_v1 }
  0xb4   : > { %v226_v10 = vsel %vm212_vm3, %v223_v60, %v225_v3  ;;  %v252_v16 = vand.u32 65535, %v222_v5  ;;  %v253_v17 = vshrl.u32 %v222_v5, 16  ;;  %v2639_v21 = vor.u32 %v352_v4, %v351_v63 }
  0xb5   : > { %v230_v14 = vand.u32 65535, %v226_v10  ;;  %v231_v15 = vshrl.u32 %v226_v10, 16  ;;  %v2643_v27 = vor.u32 %v355_v13, %v354_v12  ;;  %v358_v30 = vshrl.u32 %v2436_v44, %v2606_v55 }
  0xb6   : > { %v255_v38 = vmul.u32 %v253_v17, %v2583_v31  ;;  %v256_v40 = vmul.u32 %v252_v16, %v2586_v32  ;;  %v357_v28 = vshll.u32 %v2435_v41, %v2588_v33  ;;  %v254_v45 = vmul.u32 %v252_v16, %v2583_v31 }
  0xb7   : > { %v233_v22 = vmul.u32 %v231_v15, %v2583_v31  ;;  %v234_v25 = vmul.u32 %v230_v14, %v2586_v32  ;;  %v232_v36 = vmul.u32 %v230_v14, %v2583_v31  ;;  %v235_v42 = vmul.u32 %v231_v15, %v2586_v32 }
  0xb8   : > { %v257_v46 = vmul.u32 %v253_v17, %v2586_v32  ;;  %v258_v52 = vshll.u32 %v255_v38, 16  ;;  %v260_v54 = vshll.u32 %v256_v40, 16  ;;  %v359_v56 = vor.u32 %v358_v30, %v357_v28 }
  0xb9   : > { %v236_v43 = vshll.u32 %v233_v22, 16  ;;  %v237_v48 = vshrl.u32 %v233_v22, 16  ;;  %v238_v49 = vshll.u32 %v234_v25, 16  ;;  %v239_v51 = vshrl.u32 %v234_v25, 16 }
  0xba   : > { %vm262_vm7 = vc.u32 %v254_v45, %v258_v52  ;;  %v264_v58 = vadd.s32 %v258_v52, %v254_v45  ;;  %v361_v59 = vshrl.u32 %v2437_v47, %v2606_v55  ;;  %v360_v32 = vshll.u32 %v2436_v44, %v2588_v33 }
  0xbb   : > { %vm240_vm6 = vc.u32 %v232_v36, %v236_v43  ;;  %v242_v53 = vadd.s32 %v236_v43, %v232_v36  ;;  %v263_v31 = vsel %vm262_vm7, 1, %v2432_v0  ;;  %v363_v63 = vshll.u32 %v2437_v47, %v2588_v33 }
  0xbc   : > { %v241_v57 = vsel %vm240_vm6, 1, %v2432_v0  ;;  %v265_v62 = vadd.s32 %v263_v31, %v257_v46  ;;  %vm266_vm9 = vc.u32 %v264_v58, %v260_v54  ;;  %v362_v3 = vor.u32 %v361_v59, %v360_v32 }
  0xbd   : > { %v243_v60 = vadd.s32 %v241_v57, %v235_v42  ;;  %vm244_vm8 = vc.u32 %v242_v53, %v238_v49  ;;  %v267_v2 = vsel %vm266_vm9, 1, %v2432_v0  ;;  %v364_v4 = vshrl.u32 %v2438_v50, %v2606_v55 }
  0xbe   : > { %v245_v61 = vsel %vm244_vm8, 1, %v2432_v0  ;;  %v259_v5 = vshrl.u32 %v255_v38, 16  ;;  %v261_v10 = vshrl.u32 %v256_v40, 16  ;;  %v2667_v12 = vadd.s32 %v264_v58, %v260_v54 }
  0xbf   : > { %v247_v1 = vadd.s32 %v245_v61, %v243_v60  ;;  %v269_v13 = vadd.s32 %v267_v2, %v265_v62  ;;  %v365_v15 = vor.u32 %v364_v4, %v363_v63  ;;  %vm366_vm10 = vcmp.lt.s32.totalorder %v2637_v20, 1 }
  0xc0   : > { %vm369_vm11 = vcmp.lt.s32.totalorder %v2637_v20, 4  ;;  %vm368_vm12 = vcmp.lt.s32.totalorder %v2637_v20, 3  ;;  %v374_v33 = vsel %vm366_vm10, %v2639_v21, %v2643_v27  ;;  %vm367_vm13 = vcmp.lt.s32.totalorder %v2637_v20, 2 }
  0xc1   : > { %v248_v14 = vadd.s32 %v247_v1, %v237_v48  ;;  %v270_v16 = vadd.s32 %v269_v13, %v259_v5  ;;  %v375_v17 = vsel %vm369_vm11, %v362_v3, 920167782  ;;  %v378_v30 = vsel %vm366_vm10, %v2643_v27, %v359_v56 }
  0xc2   : > { %v376_v25 = vsel %vm368_vm12, %v359_v56, %v375_v17  ;;  %v218_v36 = vsel %vm212_vm3, %v215_v18, %v217_v19  ;;  %v379_v28 = vsel %vm369_vm11, %v365_v15, 1326507024  ;;  %v384_v43 = vshrl.u32 %v2579_v26, 16 }
  0xc3   : > { %v2678_v22 = vadd.s32 %v248_v14, %v239_v51  ;;  %v271_v38 = vadd.s32 %v270_v16, %v261_v10  ;;  %v377_v40 = vsel %vm367_vm13, %v374_v33, %v376_v25  ;;  %v380_v42 = vsel %vm368_vm12, %v362_v3, %v379_v28 }
  0xc4   : > { %v407_v45 = vand.u32 65535, %v377_v40  ;;  %v381_v34 = vsel %vm367_vm13, %v378_v30, %v380_v42  ;;  %v408_v18 = vshrl.u32 %v377_v40, 16  ;;  %v497_v19 = vshrl.u32 %v496_v29, 23 }
  0xc5   : > { %vm274_vm14 = vc.u32 %v2678_v22, %v2667_v12  ;;  %v275_v46 = vadd.s32 1, %v271_v38  ;;  %v272_v48 = vmul.u32 %v2577_v24, %v218_v36  ;;  %v385_v49 = vand.u32 65535, %v381_v34 }
  0xc6   : > { %v386_v51 = vshrl.u32 %v381_v34, 16  ;;  %v350_v53 = vshrl.u32 %v2433_v35, %v2606_v55  ;;  %v410_v54 = vmul.u32 %v408_v18, %v2595_v39  ;;  %v411_v57 = vmul.u32 %v407_v45, %v384_v43 }
  0xc7   : > { %v276_v52 = vsel %vm274_vm14, %v275_v46, %v271_v38  ;;  %v371_v59 = vsel %vm369_vm11, %v359_v56, 2102212464  ;;  %v389_v31 = vmul.u32 %v385_v49, %v384_v43  ;;  %v409_v29 = vmul.u32 %v407_v45, %v2595_v39 }
  0xc8   : > { %v277_v58 = vadd.s32 %v276_v52, %v272_v48  ;;  %v388_v60 = vmul.u32 %v386_v51, %v2595_v39  ;;  %v412_v32 = vmul.u32 %v408_v18, %v384_v43  ;;  %v413_v24 = vshll.u32 %v410_v54, 16 }
  0xc9   : > { %v2229_v61 = vadd.s32 4294967169, %v497_v19  ;;  %v387_v63 = vmul.u32 %v385_v49, %v2595_v39  ;;  %v390_v1 = vmul.u32 %v386_v51, %v384_v43  ;;  %v393_v2 = vshll.u32 %v389_v31, 16 }
  0xca   : > { %v278_v62 = vadd.s32 536870912, %v277_v58  ;;  %v391_v55 = vshll.u32 %v388_v60, 16  ;;  %v415_v3 = vshll.u32 %v411_v57, 16  ;;  %vm417_vm15 = vc.u32 %v409_v29, %v413_v24 }
  0xcb   : > { %v419_v4 = vadd.s32 %v413_v24, %v409_v29  ;;  %v418_v10 = vsel %vm417_vm15, 1, %v2432_v0  ;;  %v493_v15 = vand.u32 2147483647, %v2575_v23  ;;  %v370_v39 = vsel %vm366_vm10, %v350_v53, %v2639_v21 }
  0xcc   : > { %v279_v5 = vshrl.u32 %v278_v62, 30  ;;  %vm395_vm0 = vc.u32 %v387_v63, %v391_v55  ;;  %v397_v56 = vadd.s32 %v391_v55, %v387_v63  ;;  %v420_v14 = vadd.s32 %v418_v10, %v412_v32 }
  0xcd   : > { %v396_v13 = vsel %vm395_vm0, 1, %v2432_v0  ;;  %vm421_vm1 = vc.u32 %v419_v4, %v415_v3  ;;  %v372_v17 = vsel %vm368_vm12, %v2643_v27, %v371_v59  ;;  %v503_v36 = vadd.s32 1, %v2229_v61 }
  0xce   : > { %v280_v16 = vshll.u32 %v279_v5, 30  ;;  %v398_v33 = vadd.s32 %v396_v13, %v390_v1  ;;  %vm399_vm2 = vc.u32 %v397_v56, %v393_v2  ;;  %v422_v30 = vsel %vm421_vm1, 1, %v2432_v0 }
  0xcf   : > { %v400_v25 = vsel %vm399_vm2, 1, %v2432_v0  ;;  %v392_v40 = vshrl.u32 %v388_v60, 16  ;;  %v424_v42 = vadd.s32 %v422_v30, %v420_v14  ;;  %vm181_vm3 = vcmp.lt.s32.totalorder %v2561_v7, 0 }
  0xd0   : > { %v281_v38 = vsub.s32 %v277_v58, %v280_v16  ;;  %v402_v28 = vadd.s32 %v400_v25, %v398_v33  ;;  %v303_v43 = vsub.s32 4, %v279_v5  ;;  %v414_v45 = vshrl.u32 %v410_v54, 16 }
  0xd1   : > { %vm504_vm4 = vcmp.gt.s32.totalorder %v503_v36, 0  ;;  %v394_v46 = vshrl.u32 %v389_v31, 16  ;;  %v373_v27 = vsel %vm367_vm13, %v370_v39, %v372_v17  ;;  %v416_v18 = vshrl.u32 %v411_v57, 16 }
  0xd2   : > { %vm282_vm5 = vcmp.lt.s32.totalorder %v281_v38, 0  ;;  %v283_v21 = vsub.s32 0, %v281_v38  ;;  %v403_v34 = vadd.s32 %v402_v28, %v392_v40  ;;  %v425_v19 = vadd.s32 %v424_v42, %v414_v45 }
  0xd3   : > { %v505_v48 = vsel %vm504_vm4, %v503_v36, 0  ;;  %v2726_v52 = vadd.s32 %v419_v4, %v415_v3  ;;  %v500_v53 = vand.u32 8388607, %v493_v15  ;;  %v304_v58 = vsel %vm181_vm3, %v303_v43, %v279_v5 }
  0xd4   : > { %v284_v49 = vsel %vm282_vm5, %v283_v21, %v281_v38  ;;  %v2724_v51 = vadd.s32 %v403_v34, %v394_v46  ;;  %v426_v59 = vadd.s32 %v425_v19, %v416_v18  ;;  %v507_v60 = vand.u32 31, %v505_v48 }
  0xd5   : > { %v285_v54 = vclz %v284_v49  ;;  %vm2734_vm6 = vcmp.le.f32.partialorder %v179_v9, 0.7853982  ;;  %v273_v57 = vadd.s32 %v2667_v12, %v2678_v22  ;;  %v427_v31 = vmul.u32 %v2579_v26, %v373_v27 }
  0xd6   : > { %vm429_vm7 = vc.u32 %v2724_v51, %v2726_v52  ;;  %v430_v32 = vadd.s32 1, %v426_v59  ;;  %v508_v24 = vsub.s32 32, %v507_v60  ;;  %v306_v61 = vsel %vm2734_vm6, 0, %v304_v58 }
  0xd7   : > { %v2224_v29 = vadd.s32 4294967294, %v285_v54  ;;  %v501_v62 = vor.u32 8388608, %v500_v53  ;;  %v2745_v63 = vshrl.u32 %v505_v48, 5  ;;  %v510_v9 = vshll.u32 %v2433_v35, %v507_v60 }
  0xd8   : > { %v431_v1 = vsel %vm429_vm7, %v430_v32, %v426_v59  ;;  %v511_v12 = vshrl.u32 %v2434_v37, %v508_v24  ;;  %v513_v26 = vshll.u32 %v2434_v37, %v507_v60  ;;  %v514_v2 = vshrl.u32 %v2435_v41, %v508_v24 }
  0xd9   : > { %vm2225_vm8 = vcmp.lt.s32.totalorder %v2224_v29, 0  ;;  %v432_v55 = vadd.s32 %v431_v1, %v427_v31  ;;  %v516_v3 = vshll.u32 %v2435_v41, %v507_v60  ;;  %v517_v56 = vshrl.u32 %v2436_v44, %v508_v24 }
  0xda   : > { %v288_v22 = vsel %vm2225_vm8, 0, %v2224_v29  ;;  %v519_v10 = vshll.u32 %v2436_v44, %v507_v60  ;;  %v512_v16 = vor.u32 %v511_v12, %v510_v9  ;;  %v520_v39 = vshrl.u32 %v2437_v47, %v508_v24 }
  0xdb   : > { %v289_v4 = vsub.s32 32, %v288_v22  ;;  %v293_v5 = vsub.s32 4294967266, %v288_v22  ;;  %v290_v13 = vshll.u32 %v281_v38, %v288_v22  ;;  %v433_v14 = vadd.s32 536870912, %v432_v55 }
  0xdc   : > { %v2755_v25 = vor.u32 %v514_v2, %v513_v26  ;;  %v523_v30 = vshrl.u32 %v2438_v50, %v508_v24  ;;  %v521_v40 = vor.u32 %v520_v39, %v519_v10  ;;  %v2760_v28 = vshll.u32 %v501_v62, 8 }
  0xdd   : > { %v291_v33 = vshrl.u32 %v273_v57, %v289_v4  ;;  %v294_v17 = vadd.s32 127, %v293_v5  ;;  %v2758_v36 = vshrl.u32 %v433_v14, 30  ;;  %v518_v45 = vor.u32 %v517_v56, %v516_v3 }
  0xde   : > { %v522_v38 = vshll.u32 %v2437_v47, %v507_v60  ;;  %v323_v21 = vadd.s32 3, %v306_v61  ;;  %v2765_v34 = vadd.f32 1.5707964, %v2564_v8  ;;  %vm525_vm9 = vcmp.lt.s32.totalorder %v2745_v63, 1 }
  0xdf   : > { %v292_v42 = vor.u32 %v291_v33, %v290_v13  ;;  %v295_v43 = vshll.u32 %v294_v17, 23  ;;  %v435_v46 = vshll.u32 %v2758_v36, 30  ;;  %vm528_vm10 = vcmp.lt.s32.totalorder %v2745_v63, 4 }
  0xe0   : > { %v524_v18 = vor.u32 %v523_v30, %v522_v38  ;;  %v533_v19 = vsel %vm525_vm9, %v512_v16, %v2755_v25  ;;  %vm527_vm11 = vcmp.lt.s32.totalorder %v2745_v63, 3  ;;  %v534_v49 = vsel %vm528_vm10, %v521_v40, 920167782 }
  0xe1   : > { %v296_v27 = vor.u32 4788187, %v295_v43  ;;  %v2772_v48 = vsub.s32 %v432_v55, %v435_v46  ;;  %v542_v53 = vand.u32 65535, %v2760_v28  ;;  %v299_v58 = vcvt.s32.f32 %v292_v42 }
  0xe2   : > { %vm526_vm12 = vcmp.lt.s32.totalorder %v2745_v63, 2  ;;  %v535_v59 = vsel %vm527_vm11, %v518_v45, %v534_v49  ;;  %v543_v31 = vshrl.u32 %v2760_v28, 16  ;;  %v2786_v32 = vand.u32 3, %v323_v21  ;;  %v2237_v63 = vld [vmem:[%s2547_s26 + $0x1] ss:$4 sm:$0x3] }
  0xe3   : > { %v297_v54 = vand.u32 2147483647, %v296_v27  ;;  %vm437_vm13 = vcmp.lt.s32.totalorder %v2772_v48, 0  ;;  %v438_v60 = vsub.s32 0, %v2772_v48  ;;  %v536_v57 = vsel %vm526_vm12, %v533_v19, %v535_v59 }
  0xe4   : > { %v537_v61 = vsel %vm525_vm9, %v2755_v25, %v518_v45  ;;  %v538_v62 = vsel %vm528_vm10, %v524_v18, 1326507024  ;;  %v509_v1 = vshrl.u32 %v2433_v35, %v508_v24  ;;  %v566_v26 = vand.u32 65535, %v536_v57 }
  0xe5   : > { %v300_v29 = vmul.f32 %v299_v58, %v297_v54  ;;  %v439_v9 = vsel %vm437_vm13, %v438_v60, %v2772_v48  ;;  %v539_v12 = vsel %vm527_vm11, %v521_v40, %v538_v62  ;;  %v567_v3 = vshrl.u32 %v536_v57, 16 }
  0xe6   : > { %v440_v55 = vclz %v439_v9  ;;  %v540_v2 = vsel %vm526_vm12, %v537_v61, %v539_v12  ;;  %v428_v4 = vadd.s32 %v2726_v52, %v2724_v51  ;;  %v458_v5 = vsub.s32 4, %v2758_v36 }
  0xe7   : > { %v301_v22 = vxor.u32 2147483648, %v300_v29  ;;  %v544_v56 = vand.u32 65535, %v540_v2  ;;  %v648_v10 = vand.u32 2147483647, %v2765_v34  ;;  %v2807_v14 = vsel %vm525_vm9, %v509_v1, %v512_v16 }
  0xe8   : > { %v2227_v13 = vadd.s32 4294967294, %v440_v55  ;;  %v545_v39 = vshrl.u32 %v540_v2, 16  ;;  %v2816_v51 = vsel %vm528_vm10, %v518_v45, 2102212464  ;;  %v568_v17 = vmul.u32 %v566_v26, %v542_v53 }
  0xe9   : > { %v302_v24 = vsel %vm181_vm3, %v301_v22, %v300_v29  ;;  %v548_v52 = vmul.u32 %v544_v56, %v543_v31  ;;  %v2820_v42 = vmul.u32 %v567_v3, %v542_v53  ;;  %v546_v43 = vmul.u32 %v544_v56, %v542_v53 }
  0xea   : > { %v2812_v33 = vsel %vm2734_vm6, %v2561_v7, %v302_v24  ;;  %vm2228_vm14 = vcmp.lt.s32.totalorder %v2227_v13, 0  ;;  %v547_v40 = vmul.u32 %v545_v39, %v542_v53  ;;  %v549_v38 = vmul.u32 %v545_v39, %v543_v31 }
  0xeb   : > { %v307_v30 = vmul.f32 %v2812_v33, %v2812_v33  ;;  %v443_v16 = vsel %vm2228_vm14, 0, %v2227_v13  ;;  %v2822_v21 = vmul.u32 %v566_v26, %v543_v31  ;;  %v552_v18 = vshll.u32 %v548_v52, 16 }
  0xec   : > { %v444_v27 = vsub.s32 32, %v443_v16  ;;  %vm336_vm15 = vcmp.lt.s32.totalorder %v2564_v8, 0  ;;  %v448_v45 = vsub.s32 4294967266, %v443_v16  ;;  %v550_v19 = vshll.u32 %v547_v40, 16 }
  0xed   : > { %v308_v20 = vmul.f32 -0.001358992, %v307_v30  ;;  %v315_v46 = vmul.f32 -0.00019511016, %v307_v30  ;;  %v553_v49 = vshrl.u32 %v548_v52, 16  ;;  %v571_v54 = vmul.u32 %v567_v3, %v543_v31 }
  0xee   : > { %v445_v60 = vshll.u32 %v2772_v48, %v443_v16  ;;  %v446_v57 = vshrl.u32 %v428_v4, %v444_v27  ;;  %v449_v29 = vadd.s32 127, %v448_v45  ;;  %vm554_vm0 = vc.u32 %v546_v43, %v550_v19 }
  0xef   : > { %v309_v58 = vadd.f32 0.041655596, %v308_v20  ;;  %v316_v59 = vadd.f32 0.008332121, %v315_v46  ;;  %v556_v53 = vadd.s32 %v550_v19, %v546_v43  ;;  %v572_v61 = vshll.u32 %v2820_v42, 16 }
  0xf0   : > { %v447_v1 = vor.u32 %v446_v57, %v445_v60  ;;  %v555_v12 = vsel %vm554_vm0, 1, %v2432_v0  ;;  %vm2830_vm1 = vcmp.le.f32.partialorder %v334_v11, 0.7853982  ;;  %v450_v31 = vshll.u32 %v449_v29, 23 }
  0xf1   : > { %v310_v62 = vmul.f32 %v309_v58, %v307_v30  ;;  %v317_v9 = vmul.f32 %v316_v59, %v307_v30  ;;  %v551_v22 = vshrl.u32 %v547_v40, 16  ;;  %v557_v48 = vadd.s32 %v555_v12, %v549_v38 }
  0xf2   : > { %vm558_vm2 = vc.u32 %v556_v53, %v552_v18  ;;  %v574_v4 = vshll.u32 %v2822_v21, 16  ;;  %vm326_vm3 = vcmp.eq.s32.totalorder %v2786_v32, 0  ;;  %v451_v56 = vor.u32 4788187, %v450_v31 }
  0xf3   : > { %v311_v55 = vadd.f32 -0.4999988, %v310_v62  ;;  %v318_v2 = vadd.f32 -0.16666654, %v317_v9  ;;  %v559_v3 = vsel %vm558_vm2, 1, %v2432_v0  ;;  %vm576_vm4 = vc.u32 %v568_v17, %v572_v61 }
  0xf4   : > { %v561_v24 = vadd.s32 %v559_v3, %v557_v48  ;;  %v578_v13 = vadd.s32 %v572_v61, %v568_v17  ;;  %vm325_vm5 = vcmp.lt.s32.totalorder %v2786_v32, 2  ;;  %v454_v52 = vcvt.s32.f32 %v447_v1 }
  0xf5   : > { %v312_v11 = vmul.f32 %v311_v55, %v307_v30  ;;  %v319_v39 = vmul.f32 %v318_v2, %v307_v30  ;;  %v577_v40 = vsel %vm576_vm4, 1, %v2432_v0  ;;  %vm322_vm6 = vweird.f32 %v2561_v7 }
  0xf6   : > { %v452_v16 = vand.u32 2147483647, %v451_v56  ;;  %v562_v43 = vadd.s32 %v561_v24, %v551_v22  ;;  %v579_v38 = vadd.s32 %v577_v40, %v571_v54  ;;  %vm580_vm7 = vc.u32 %v578_v13, %v574_v4 }
  0xf7   : > { %v313_v20 = vadd.f32 1.0, %v312_v11  ;;  %v320_v46 = vadd.f32 1.0, %v319_v39  ;;  %v459_v17 = vsel %vm336_vm15, %v458_v5, %v2758_v36  ;;  %v581_v30 = vsel %vm580_vm7, 1, %v2432_v0 }
  0xf8   : > { %v455_v27 = vmul.f32 %v454_v52, %v452_v16  ;;  %v563_v18 = vadd.s32 %v562_v43, %v553_v49  ;;  %v573_v45 = vshrl.u32 %v2820_v42, 16  ;;  %v583_v19 = vadd.s32 %v581_v30, %v579_v38 }
  0xf9   : > { %v321_v58 = vmul.f32 %v320_v46, %v2812_v33  ;;  %v330_v54 = vxor.u32 2147483648, %v313_v20  ;;  %v531_v59 = vsel %vm527_vm11, %v2755_v25, %v2816_v51  ;;  %v651_v60 = vand.u32 2139095040, %v2765_v34 }
  0xfa   : > { %v456_v57 = vxor.u32 2147483648, %v455_v27  ;;  %v575_v36 = vshrl.u32 %v2822_v21, 16  ;;  %v582_v5 = vadd.s32 %v578_v13, %v574_v4  ;;  %v584_v29 = vadd.s32 %v583_v19, %v573_v45 }
  0xfb   : > { %v327_v49 = vxor.u32 2147483648, %v321_v58  ;;  %vm329_vm8 = vcmp.eq.s32.totalorder %v2786_v32, 2  ;;  %v461_v33 = vsel %vm2830_vm1, 0, %v459_v17  ;;  %v652_v42 = vshrl.u32 %v651_v60, 23 }
  0xfc   : > { %v457_v53 = vsel %vm336_vm15, %v456_v57, %v455_v27  ;;  %v532_v25 = vsel %vm526_vm12, %v2807_v14, %v531_v59  ;;  %v585_v51 = vadd.s32 %v584_v29, %v575_v36  ;;  %vm588_vm9 = vc.u32 %v563_v18, %v582_v5 }
  0xfd   : > { %v328_v21 = vsel %vm326_vm3, %v313_v20, %v327_v49  ;;  %v331_v61 = vsel %vm329_vm8, %v330_v54, %v321_v58  ;;  %v460_v62 = vsel %vm2830_vm1, %v2564_v8, %v457_v53  ;;  %v2232_v9 = vadd.s32 4294967169, %v652_v42 }
  0xfe   : > { %v332_v1 = vsel %vm325_vm5, %v328_v21, %v331_v61  ;;  %v462_v12 = vmul.f32 %v460_v62, %v460_v62  ;;  %v478_v31 = vadd.s32 3, %v461_v33  ;;  %v589_v22 = vadd.s32 1, %v585_v51 }
  0xff   : > { %v333_v14 = vsel %vm322_vm6, nan, %v332_v1  ;;  %v586_v48 = vmul.u32 %v2760_v28, %v532_v25  ;;  %v655_v55 = vand.u32 8388607, %v648_v10  ;;  %v658_v2 = vadd.s32 1, %v2232_v9 }
 0x100   : > { %v463_v3 = vmul.f32 -0.001358992, %v462_v12  ;;  %v470_v26 = vmul.f32 -0.00019511016, %v462_v12  ;;  %489 = vst [vmem:[%s2878_s29] sm:$0x3f] %v333_v14  ;;  %v590_v32 = vsel %vm588_vm9, %v589_v22, %v585_v51  ;;  %v479_v13 = vand.u32 3, %v478_v31 }
 0x101   : > { %v591_v4 = vadd.s32 %v590_v32, %v586_v48  ;;  %vm659_vm10 = vcmp.gt.s32.totalorder %v658_v2, 0  ;;  %v2882_v39 = vmul.f32 6.2831855, %v2237_v63  ;;  %v656_v16 = vor.u32 8388608, %v655_v55 }
 0x102   : > { %v464_v56 = vadd.f32 0.041655596, %v463_v3  ;;  %v471_v7 = vadd.f32 0.008332121, %v470_v26  ;;  %v660_v24 = vsel %vm659_vm10, %v658_v2, 0  ;;  %vm481_vm11 = vcmp.eq.s32.totalorder %v479_v13, 0 }
 0x103   : > { %v592_v28 = vadd.s32 536870912, %v591_v4  ;;  %v662_v11 = vand.u32 31, %v660_v24  ;;  %vm484_vm12 = vcmp.eq.s32.totalorder %v479_v13, 2  ;;  %v2888_v17 = vadd.s32 %v582_v5, %v563_v18 }
 0x104   : > { %v465_v52 = vmul.f32 %v464_v56, %v462_v12  ;;  %v472_v40 = vmul.f32 %v471_v7, %v462_v12  ;;  %v824_v27 = vperm.slane %v2882_v39, 0  ;;  %vm480_vm13 = vcmp.lt.s32.totalorder %v479_v13, 2 }
 0x105   : > { %v2884_v43 = vshrl.u32 %v592_v28, 30  ;;  %v2886_v38 = vsub.s32 32, %v662_v11  ;;  %v2892_v58 = vshll.u32 %v656_v16, 8  ;;  %v825_v54 = vperm.slane %v2882_v39, 1 }
 0x106   : > { %v466_v20 = vadd.f32 -0.4999988, %v465_v52  ;;  %v473_v46 = vadd.f32 -0.16666654, %v472_v40  ;;  %vm477_vm14 = vweird.f32 %v2564_v8  ;;  %v2898_v60 = vshrl.u32 %v660_v24, 5 }
 0x107   : > { %v594_v30 = vshll.u32 %v2884_v43, 30  ;;  %v666_v18 = vshrl.u32 %v2434_v37, %v2886_v38  ;;  %v669_v57 = vshrl.u32 %v2435_v41, %v2886_v38  ;;  %v665_v29 = vshll.u32 %v2433_v35, %v662_v11 }
 0x108   : > { %v467_v45 = vmul.f32 %v466_v20, %v462_v12  ;;  %v474_v19 = vmul.f32 %v473_v46, %v462_v12  ;;  %v675_v49 = vshrl.u32 %v2437_v47, %v2886_v38  ;;  %v668_v42 = vshll.u32 %v2434_v37, %v662_v11 }
 0x109   : > { %v2896_v59 = vsub.s32 %v591_v4, %v594_v30  ;;  %v672_v53 = vshrl.u32 %v2436_v44, %v2886_v38  ;;  %v671_v21 = vshll.u32 %v2435_v41, %v662_v11  ;;  %v674_v61 = vshll.u32 %v2436_v44, %v662_v11 }
 0x10a   : > { %v468_v36 = vadd.f32 1.0, %v467_v45  ;;  %v475_v5 = vadd.f32 1.0, %v474_v19  ;;  %v2915_v1 = vor.u32 %v666_v18, %v665_v29  ;;  %v2917_v12 = vor.u32 %v669_v57, %v668_v42 }
 0x10b   : > { %vm596_vm15 = vcmp.lt.s32.totalorder %v2896_v59, 0  ;;  %v597_v33 = vsub.s32 0, %v2896_v59  ;;  %v678_v31 = vshrl.u32 %v2438_v50, %v2886_v38  ;;  %vm495_vm0 = vcmp.lt.s32.totalorder %v2575_v23, 0 }
 0x10c   : > { %v476_v25 = vmul.f32 %v475_v5, %v460_v62  ;;  %v485_v51 = vxor.u32 2147483648, %v468_v36  ;;  %v676_v14 = vor.u32 %v675_v49, %v674_v61  ;;  %v2923_v62 = vmul.f32 %v824_v27, %v2558_v6 }
 0x10d   : > { %v598_v9 = vsel %vm596_vm15, %v597_v33, %v2896_v59  ;;  %v2925_v48 = vor.u32 %v672_v53, %v671_v21  ;;  %v677_v55 = vshll.u32 %v2437_v47, %v662_v11  ;;  %v697_v2 = vand.u32 65535, %v2892_v58 }
 0x10e   : > { %v482_v22 = vxor.u32 2147483648, %v476_v25  ;;  %v599_v63 = vclz %v598_v9  ;;  %v698_v3 = vshrl.u32 %v2892_v58, 16  ;;  %v486_v32 = vsel %vm484_vm12, %v485_v51, %v476_v25 }
 0x10f   : > { %vm680_vm1 = vcmp.lt.s32.totalorder %v2898_v60, 1  ;;  %vm2936_vm2 = vcmp.le.f32.partialorder %v493_v15, 0.7853982  ;;  %v679_v24 = vor.u32 %v678_v31, %v677_v55  ;;  %vm683_vm3 = vcmp.lt.s32.totalorder %v2898_v60, 4 }
 0x110   : > { %v483_v26 = vsel %vm481_vm11, %v468_v36, %v482_v22  ;;  %v2230_v4 = vadd.s32 4294967294, %v599_v63  ;;  %v688_v28 = vsel %vm680_vm1, %v2915_v1, %v2917_v12  ;;  %vm682_vm5 = vcmp.lt.s32.totalorder %v2898_v60, 3 }
 0x111   : > { %v487_v56 = vsel %vm480_vm13, %v483_v26, %v486_v32  ;;  %v689_v15 = vsel %vm683_vm3, %v676_v14, 920167782  ;;  %v617_v52 = vsub.s32 4, %v2884_v43  ;;  %vm681_vm6 = vcmp.lt.s32.totalorder %v2898_v60, 2 }
 0x112   : > { %v488_v11 = vsel %vm477_vm14, nan, %v487_v56  ;;  %vm2231_vm4 = vcmp.lt.s32.totalorder %v2230_v4, 0  ;;  %v690_v40 = vsel %vm682_vm5, %v2925_v48, %v689_v15  ;;  %v692_v46 = vsel %vm680_vm1, %v2917_v12, %v2925_v48 }
 0x113   : > { %490 = vst [vmem:[%s2878_s29 + $0x8] sm:$0x3f] %v488_v11  ;;  %v602_v13 = vsel %vm2231_vm4, 0, %v2230_v4  ;;  %v691_v8 = vsel %vm681_vm6, %v688_v28, %v690_v40  ;;  %v693_v30 = vsel %vm683_vm3, %v679_v24, 1326507024  ;;  %v618_v29 = vsel %vm495_vm0, %v617_v52, %v2884_v43 }
 0x114   : > { %v603_v16 = vsub.s32 32, %v602_v13  ;;  %v607_v20 = vsub.s32 4294967266, %v602_v13  ;;  %v721_v27 = vand.u32 65535, %v691_v8  ;;  %v722_v45 = vshrl.u32 %v691_v8, 16 }
 0x115   : > { %v830_v19 = vand.u32 2147483647, %v2923_v62  ;;  %v604_v18 = vshll.u32 %v2896_v59, %v602_v13  ;;  %v694_v5 = vsel %vm682_vm5, %v676_v14, %v693_v30  ;;  %v833_v9 = vand.u32 2139095040, %v2923_v62 }
 0x116   : > { %v605_v57 = vshrl.u32 %v2888_v17, %v603_v16  ;;  %v608_v36 = vadd.s32 127, %v607_v20  ;;  %v695_v49 = vsel %vm681_vm6, %v692_v46, %v694_v5  ;;  %v724_v33 = vmul.u32 %v722_v45, %v697_v2 }
 0x117   : > { %v725_v42 = vmul.u32 %v721_v27, %v698_v3  ;;  %v699_v51 = vand.u32 65535, %v695_v49  ;;  %v700_v21 = vshrl.u32 %v695_v49, 16  ;;  %v664_v17 = vshrl.u32 %v2433_v35, %v2886_v38 }
 0x118   : > { %v606_v53 = vor.u32 %v605_v57, %v604_v18  ;;  %v609_v25 = vshll.u32 %v608_v36, 23  ;;  %v723_v59 = vmul.u32 %v721_v27, %v697_v2  ;;  %v727_v61 = vshll.u32 %v724_v33, 16 }
 0x119   : > { %v620_v43 = vsel %vm2936_vm2, 0, %v618_v29  ;;  %v702_v22 = vmul.u32 %v700_v21, %v697_v2  ;;  %v726_v63 = vmul.u32 %v722_v45, %v698_v3  ;;  %v703_v55 = vmul.u32 %v699_v51, %v698_v3 }
 0x11a   : > { %v610_v31 = vor.u32 4788187, %v609_v25  ;;  %v613_v14 = vcvt.s32.f32 %v606_v53  ;;  %v729_v26 = vshll.u32 %v725_v42, 16  ;;  %vm731_vm7 = vc.u32 %v723_v59, %v727_v61 }
 0x11b   : > { %v701_v4 = vmul.u32 %v699_v51, %v697_v2  ;;  %v705_v56 = vshll.u32 %v702_v22, 16  ;;  %v732_v24 = vsel %vm731_vm7, 1, %v2432_v0  ;;  %v704_v38 = vmul.u32 %v700_v21, %v698_v3 }
 0x11c   : > { %v611_v32 = vand.u32 2147483647, %v610_v31  ;;  %v707_v28 = vshll.u32 %v703_v55, 16  ;;  %v733_v11 = vadd.s32 %v727_v61, %v723_v59  ;;  %v734_v15 = vadd.s32 %v732_v24, %v726_v63 }
 0x11d   : > { %vm709_vm8 = vc.u32 %v701_v4, %v705_v56  ;;  %v711_v52 = vadd.s32 %v705_v56, %v701_v4  ;;  %v834_v40 = vshrl.u32 %v833_v9, 23  ;;  %v684_v16 = vsel %vm680_vm1, %v664_v17, %v2915_v1 }
 0x11e   : > { %v614_v13 = vmul.f32 %v613_v14, %v611_v32  ;;  %v685_v20 = vsel %vm683_vm3, %v2925_v48, 2102212464  ;;  %v710_v2 = vsel %vm709_vm8, 1, %v2432_v0  ;;  %vm735_vm9 = vc.u32 %v733_v11, %v729_v26 }
 0x11f   : > { %v712_v3 = vadd.s32 %v710_v2, %v704_v38  ;;  %vm713_vm10 = vc.u32 %v711_v52, %v707_v28  ;;  %v736_v46 = vsel %vm735_vm9, 1, %v2432_v0  ;;  %v728_v27 = vshrl.u32 %v724_v33, 16 }
 0x120   : > { %v615_v8 = vxor.u32 2147483648, %v614_v13  ;;  %v714_v30 = vsel %vm713_vm10, 1, %v2432_v0  ;;  %v738_v45 = vadd.s32 %v736_v46, %v734_v15  ;;  %v2238_v18 = vadd.s32 4294967169, %v834_v40 }
 0x121   : > { %v686_v48 = vsel %vm682_vm5, %v2917_v12, %v685_v20  ;;  %v706_v57 = vshrl.u32 %v702_v22, 16  ;;  %v716_v36 = vadd.s32 %v714_v30, %v712_v3  ;;  %v730_v29 = vshrl.u32 %v725_v42, 16 }
 0x122   : > { %v616_v1 = vsel %vm495_vm0, %v615_v8, %v614_v13  ;;  %v739_v49 = vadd.s32 %v738_v45, %v728_v27  ;;  %v840_v53 = vadd.s32 1, %v2238_v18  ;;  %v637_v33 = vadd.s32 3, %v620_v43 }
 0x123   : > { %v619_v5 = vsel %vm2936_vm2, %v2575_v23, %v616_v1  ;;  %v708_v51 = vshrl.u32 %v703_v55, 16  ;;  %v717_v21 = vadd.s32 %v716_v36, %v706_v57  ;;  %v687_v17 = vsel %vm681_vm6, %v684_v16, %v686_v48 }
 0x124   : > { %v621_v25 = vmul.f32 %v619_v5, %v619_v5  ;;  %v2999_v59 = vadd.s32 %v733_v11, %v729_v26  ;;  %v740_v61 = vadd.s32 %v739_v49, %v730_v29  ;;  %vm841_vm11 = vcmp.gt.s32.totalorder %v840_v53, 0 }
 0x125   : > { %v3001_v31 = vadd.s32 %v717_v21, %v708_v51  ;;  %v842_v7 = vsel %vm841_vm11, %v840_v53, 0  ;;  %v837_v42 = vand.u32 8388607, %v830_v19  ;;  %v741_v55 = vmul.u32 %v2892_v58, %v687_v17 }
 0x126   : > { %v622_v12 = vmul.f32 -0.001358992, %v621_v25  ;;  %v629_v9 = vmul.f32 -0.00019511016, %v621_v25  ;;  %v744_v22 = vadd.s32 1, %v740_v61  ;;  %v844_v63 = vand.u32 31, %v842_v7 }
 0x127   : > { %vm743_vm12 = vc.u32 %v3001_v31, %v2999_v59  ;;  %v3008_v60 = vand.u32 3, %v637_v33  ;;  %v3013_v38 = vmul.f32 %v825_v54, %v2558_v6  ;;  %v838_v28 = vor.u32 8388608, %v837_v42 }
 0x128   : > { %v623_v43 = vadd.f32 0.041655596, %v622_v12  ;;  %v630_v14 = vadd.f32 0.008332121, %v629_v9  ;;  %v745_v26 = vsel %vm743_vm12, %v744_v22, %v740_v61  ;;  %v845_v32 = vsub.s32 32, %v844_v63 }
 0x129   : > { %v746_v24 = vadd.s32 %v745_v26, %v741_v55  ;;  %v3015_v11 = vshrl.u32 %v842_v7, 5  ;;  %v847_v16 = vshll.u32 %v2433_v35, %v844_v63  ;;  %vm640_vm13 = vcmp.eq.s32.totalorder %v3008_v60, 0 }
 0x12a   : > { %v624_v4 = vmul.f32 %v623_v43, %v621_v25  ;;  %v631_v56 = vmul.f32 %v630_v14, %v621_v25  ;;  %v848_v58 = vshrl.u32 %v2434_v37, %v845_v32  ;;  %v851_v15 = vshrl.u32 %v2435_v41, %v845_v32 }
 0x12b   : > { %v747_v40 = vadd.s32 536870912, %v746_v24  ;;  %v850_v20 = vshll.u32 %v2434_v37, %v844_v63  ;;  %v854_v39 = vshrl.u32 %v2436_v44, %v845_v32  ;;  %v856_v54 = vshll.u32 %v2436_v44, %v844_v63 }
 0x12c   : > { %v625_v13 = vadd.f32 -0.4999988, %v624_v4  ;;  %v632_v52 = vadd.f32 -0.16666654, %v631_v56  ;;  %v857_v2 = vshrl.u32 %v2437_v47, %v845_v32  ;;  %v853_v30 = vshll.u32 %v2435_v41, %v844_v63 }
 0x12d   : > { %v748_v46 = vshrl.u32 %v747_v40, 30  ;;  %v849_v27 = vor.u32 %v848_v58, %v847_v16  ;;  %v3026_v45 = vor.u32 %v851_v15, %v850_v20  ;;  %v860_v1 = vshrl.u32 %v2438_v50, %v845_v32 }
 0x12e   : > { %v626_v8 = vmul.f32 %v625_v13, %v621_v25  ;;  %v633_v3 = vmul.f32 %v632_v52, %v621_v25  ;;  %v858_v18 = vor.u32 %v857_v2, %v856_v54  ;;  %vm639_vm14 = vcmp.lt.s32.totalorder %v3008_v60, 2 }
 0x12f   : > { %vm643_vm15 = vcmp.eq.s32.totalorder %v3008_v60, 2  ;;  %v749_v36 = vshll.u32 %v748_v46, 30  ;;  %v855_v29 = vor.u32 %v854_v39, %v853_v30  ;;  %v859_v49 = vshll.u32 %v2437_v47, %v844_v63 }
 0x130   : > { %v627_v48 = vadd.f32 1.0, %v626_v8  ;;  %v634_v57 = vadd.f32 1.0, %v633_v3  ;;  %v3032_v53 = vshll.u32 %v838_v28, 8  ;;  %v985_v25 = vand.u32 2147483647, %v3013_v38 }
 0x131   : > { %vm650_vm0 = vcmp.lt.s32.totalorder %v2765_v34, 0  ;;  %v750_v51 = vsub.s32 %v746_v24, %v749_v36  ;;  %vm862_vm1 = vcmp.lt.s32.totalorder %v3015_v11, 1  ;;  %vm865_vm2 = vcmp.lt.s32.totalorder %v3015_v11, 4 }
 0x132   : > { %v635_v33 = vmul.f32 %v634_v57, %v619_v5  ;;  %vm636_vm3 = vweird.f32 %v2575_v23  ;;  %v861_v21 = vor.u32 %v860_v1, %v859_v49  ;;  %vm864_vm4 = vcmp.lt.s32.totalorder %v3015_v11, 3 }
 0x133   : > { %v870_v17 = vsel %vm862_vm1, %v849_v27, %v3026_v45  ;;  %v871_v61 = vsel %vm865_vm2, %v858_v18, 920167782  ;;  %v644_v12 = vxor.u32 2147483648, %v627_v48  ;;  %vm751_vm5 = vcmp.lt.s32.totalorder %v750_v51, 0 }
 0x134   : > { %v641_v5 = vxor.u32 2147483648, %v635_v33  ;;  %v752_v9 = vsub.s32 0, %v750_v51  ;;  %vm863_vm6 = vcmp.lt.s32.totalorder %v3015_v11, 2  ;;  %v872_v7 = vsel %vm864_vm4, %v855_v29, %v871_v61 }
 0x135   : > { %v879_v22 = vand.u32 65535, %v3032_v53  ;;  %v880_v42 = vshrl.u32 %v3032_v53, 16  ;;  %v846_v14 = vshrl.u32 %v2433_v35, %v845_v32  ;;  %v873_v55 = vsel %vm863_vm6, %v870_v17, %v872_v7 }
 0x136   : > { %v642_v63 = vsel %vm640_vm13, %v627_v48, %v641_v5  ;;  %v753_v43 = vsel %vm751_vm5, %v752_v9, %v750_v51  ;;  %v772_v4 = vsub.s32 4, %v748_v46  ;;  %v874_v56 = vsel %vm862_vm1, %v3026_v45, %v855_v29 }
 0x137   : > { %v754_v26 = vclz %v753_v43  ;;  %v875_v24 = vsel %vm865_vm2, %v861_v21, 1326507024  ;;  %v645_v28 = vsel %vm643_vm15, %v644_v12, %v635_v33  ;;  %v903_v15 = vand.u32 65535, %v873_v55 }
 0x138   : > { %v876_v58 = vsel %vm864_vm4, %v858_v18, %v875_v24  ;;  %v904_v32 = vshrl.u32 %v873_v55, 16  ;;  %v646_v13 = vsel %vm639_vm14, %v642_v63, %v645_v28  ;;  %v742_v52 = vadd.s32 %v2999_v59, %v3001_v31 }
 0x139   : > { %v2233_v40 = vadd.s32 4294967294, %v754_v26  ;;  %v988_v16 = vand.u32 2139095040, %v3013_v38  ;;  %v3071_v20 = vsel %vm862_vm1, %v846_v14, %v849_v27  ;;  %v877_v39 = vsel %vm863_vm6, %v874_v56, %v876_v58 }
 0x13a   : > { %v906_v54 = vmul.u32 %v904_v32, %v879_v22  ;;  %v3075_v2 = vmul.u32 %v903_v15, %v880_v42  ;;  %v3079_v60 = vsel %vm650_vm0, %v772_v4, %v748_v46  ;;  %v881_v8 = vand.u32 65535, %v877_v39 }
 0x13b   : > { %vm2234_vm7 = vcmp.lt.s32.totalorder %v2233_v40, 0  ;;  %v882_v59 = vshrl.u32 %v877_v39, 16  ;;  %v647_v31 = vsel %vm636_vm3, nan, %v646_v13  ;;  %v867_v30 = vsel %vm865_vm2, %v855_v29, 2102212464 }
 0x13c   : > { %v757_v3 = vsel %vm2234_vm7, 0, %v2233_v40  ;;  %v909_v27 = vshll.u32 %v906_v54, 16  ;;  %v905_v48 = vmul.u32 %v903_v15, %v879_v22  ;;  %v908_v57 = vmul.u32 %v904_v32, %v880_v42 }
 0x13d   : > { %v758_v18 = vsub.s32 32, %v757_v3  ;;  %v762_v1 = vsub.s32 4294967266, %v757_v3  ;;  %v759_v36 = vshll.u32 %v750_v51, %v757_v3  ;;  %v884_v49 = vmul.u32 %v882_v59, %v879_v22  ;;  %v2331_v51 = vld [vmem:[%s2547_s26] ss:$4 sm:$0x3] }
 0x13e   : > { %v885_v33 = vmul.u32 %v881_v8, %v880_v42  ;;  %v911_v46 = vshll.u32 %v3075_v2, 16  ;;  %v883_v61 = vmul.u32 %v881_v8, %v879_v22  ;;  %vm913_vm8 = vc.u32 %v905_v48, %v909_v27 }
 0x13f   : > { %v760_v21 = vshrl.u32 %v742_v52, %v758_v18  ;;  %v763_v17 = vadd.s32 127, %v762_v1  ;;  %v886_v23 = vmul.u32 %v882_v59, %v880_v42  ;;  %v887_v5 = vshll.u32 %v884_v49, 16 }
 0x140   : > { %v889_v12 = vshll.u32 %v885_v33, 16  ;;  %v915_v29 = vadd.s32 %v909_v27, %v905_v48  ;;  %v805_v63 = vrot.slane %v647_v31, 6  ;;  %v914_v43 = vsel %vm913_vm8, 1, %v2432_v0 }
 0x141   : > { %v761_v9 = vor.u32 %v760_v21, %v759_v36  ;;  %v764_v7 = vshll.u32 %v763_v17, 23  ;;  %v2235_v14 = vadd.f32 -0.5, %v2331_v51  ;;  %vm891_vm9 = vc.u32 %v883_v61, %v887_v5 }
 0x142   : > { %v893_v55 = vadd.s32 %v887_v5, %v883_v61  ;;  %v916_v26 = vadd.s32 %v914_v43, %v908_v57  ;;  %809 = vst [vmem:[%s2878_s29 + $0x20] sm:$0xfc] %v805_v63  ;;  %v813_v22 = vlaneseq  ;;  %v892_v42 = vsel %vm891_vm9, 1, %v2432_v0 }
 0x143   : > { %v765_v4 = vor.u32 4788187, %v764_v7  ;;  %v768_v56 = vcvt.s32.f32 %v761_v9  ;;  %v812_v24 = vmul.f32 2.0, %v2235_v14  ;;  %v894_v28 = vadd.s32 %v892_v42, %v886_v23 }
 0x144   : > { %vm895_vm10 = vc.u32 %v893_v55, %v889_v12  ;;  %vm917_vm11 = vc.u32 %v915_v29, %v911_v46  ;;  %vm3090_vm12 = vcmp.lt.s32.totalorder %v813_v22, 256  ;;  %v888_v52 = vshrl.u32 %v884_v49, 16 }
 0x145   : > { %v766_v58 = vand.u32 2147483647, %v765_v4  ;;  %v896_v32 = vsel %vm895_vm10, 1, %v2432_v0  ;;  %v918_v13 = vsel %vm917_vm11, 1, %v2432_v0  ;;  %v910_v39 = vshrl.u32 %v906_v54, 16 }
 0x146   : > { %2236 = vst.msk [vmem:[%s2878_s29 + $0x44] ss:$8 sm:$0x3] %vm3090_vm12, %v812_v24  ;;  %v898_v40 = vadd.s32 %v896_v32, %v894_v28  ;;  %v920_v8 = vadd.s32 %v918_v13, %v916_v26  ;;  %v868_v31 = vsel %vm864_vm4, %v3026_v45, %v867_v30  ;;  %v912_v3 = vshrl.u32 %v3075_v2, 16 }
 0x147   : > { %v769_v59 = vmul.f32 %v768_v56, %v766_v58  ;;  %v989_v27 = vshrl.u32 %v988_v16, 23  ;;  %v890_v18 = vshrl.u32 %v885_v33, 16  ;;  %v992_v57 = vand.u32 8388607, %v985_v25 }
 0x148   : > { %v899_v1 = vadd.s32 %v898_v40, %v888_v52  ;;  %v921_v48 = vadd.s32 %v920_v8, %v910_v39  ;;  %vm3107_vm13 = vcmp.le.f32.partialorder %v648_v10, 0.7853982  ;;  %v869_v45 = vsel %vm863_vm6, %v3071_v20, %v868_v31 }
 0x149   : > { %v770_v54 = vxor.u32 2147483648, %v769_v59  ;;  %v2241_v49 = vadd.s32 4294967169, %v989_v27  ;;  %v919_v16 = vadd.s32 %v915_v29, %v911_v46  ;;  %v775_v21 = vsel %vm3107_vm13, 0, %v3079_v60 }
 0x14a   : > { %v900_v2 = vadd.s32 %v899_v1, %v890_v18  ;;  %v922_v30 = vadd.s32 %v921_v48, %v912_v3  ;;  %v993_v23 = vor.u32 8388608, %v992_v57  ;;  %v923_v20 = vmul.u32 %v3032_v53, %v869_v45 }
 0x14b   : > { %v771_v33 = vsel %vm650_vm0, %v770_v54, %v769_v59  ;;  %v995_v10 = vadd.s32 1, %v2241_v49  ;;  %v792_v46 = vadd.s32 3, %v775_v21  ;;  %v3124_v60 = vadd.f32 1.5707964, %v2923_v62 }
 0x14c   : > { %v774_v17 = vsel %vm3107_vm13, %v2765_v34, %v771_v33  ;;  %vm925_vm14 = vc.u32 %v900_v2, %v919_v16  ;;  %v926_v61 = vadd.s32 1, %v922_v30  ;;  %v3126_v43 = vshll.u32 %v993_v23, 8 }
 0x14d   : > { %v776_v11 = vmul.f32 %v774_v17, %v774_v17  ;;  %vm996_vm15 = vcmp.gt.s32.totalorder %v995_v10, 0  ;;  %v793_v26 = vand.u32 3, %v792_v46  ;;  %v1152_v42 = vand.u32 2147483647, %v3124_v60 }
 0x14e   : > { %v927_v5 = vsel %vm925_vm14, %v926_v61, %v922_v30  ;;  %v997_v12 = vsel %vm996_vm15, %v995_v10, 0  ;;  %v3131_v24 = vadd.s32 %v919_v16, %v900_v2  ;;  %v3134_v28 = vand.u32 65535, %v3126_v43 }
 0x14f   : > { %v777_v29 = vmul.f32 -0.001358992, %v776_v11  ;;  %v784_v9 = vmul.f32 -0.00019511016, %v776_v11  ;;  %v928_v7 = vadd.s32 %v927_v5, %v923_v20  ;;  %v999_v63 = vand.u32 31, %v997_v12 }
 0x150   : > { %v3137_v58 = vshrl.u32 %v3126_v43, 16  ;;  %v1155_v32 = vand.u32 2139095040, %v3124_v60  ;;  %v3141_v39 = vshrl.u32 %v997_v12, 5  ;;  %vm795_vm0 = vcmp.eq.s32.totalorder %v793_v26, 0 }
 0x151   : > { %v778_v51 = vadd.f32 0.041655596, %v777_v29  ;;  %v785_v14 = vadd.f32 0.008332121, %v784_v9  ;;  %v929_v55 = vadd.s32 536870912, %v928_v7  ;;  %v1000_v4 = vsub.s32 32, %v999_v63 }
 0x152   : > { %vm798_vm1 = vcmp.eq.s32.totalorder %v793_v26, 2  ;;  %v1002_v8 = vshll.u32 %v2433_v35, %v999_v63  ;;  %vm794_vm2 = vcmp.lt.s32.totalorder %v793_v26, 2  ;;  %vm791_vm3 = vweird.f32 %v2765_v34 }
 0x153   : > { %v779_v56 = vmul.f32 %v778_v51, %v776_v11  ;;  %v786_v53 = vmul.f32 %v785_v14, %v776_v11  ;;  %v3128_v22 = vshrl.u32 %v929_v55, 30  ;;  %v1003_v59 = vshrl.u32 %v2434_v37, %v1000_v4 }
 0x154   : > { %v1006_v31 = vshrl.u32 %v2435_v41, %v1000_v4  ;;  %v1009_v3 = vshrl.u32 %v2436_v44, %v1000_v4  ;;  %v1012_v48 = vshrl.u32 %v2437_v47, %v1000_v4  ;;  %v1005_v57 = vshll.u32 %v2434_v37, %v999_v63 }
 0x155   : > { %v780_v13 = vadd.f32 -0.4999988, %v779_v56  ;;  %v787_v52 = vadd.f32 -0.16666654, %v786_v53  ;;  %v931_v40 = vshll.u32 %v3128_v22, 30  ;;  %v1008_v36 = vshll.u32 %v2435_v41, %v999_v63 }
 0x156   : > { %v1011_v54 = vshll.u32 %v2436_v44, %v999_v63  ;;  %v1015_v49 = vshrl.u32 %v2438_v50, %v1000_v4  ;;  %v1004_v30 = vor.u32 %v1003_v59, %v1002_v8  ;;  %v1007_v33 = vor.u32 %v1006_v31, %v1005_v57 }
 0x157   : > { %v781_v27 = vmul.f32 %v780_v13, %v776_v11  ;;  %v788_v18 = vmul.f32 %v787_v52, %v776_v11  ;;  %v3147_v1 = vsub.s32 %v928_v7, %v931_v40  ;;  %v1010_v21 = vor.u32 %v1009_v3, %v1008_v36 }
 0x158   : > { %v1014_v10 = vshll.u32 %v2437_v47, %v999_v63  ;;  %v1013_v20 = vor.u32 %v1012_v48, %v1011_v54  ;;  %vm832_vm5 = vcmp.lt.s32.totalorder %v2923_v62, 0  ;;  %vm1017_vm6 = vcmp.lt.s32.totalorder %v3141_v39, 1 }
 0x159   : > { %v782_v45 = vadd.f32 1.0, %v781_v27  ;;  %v789_v2 = vadd.f32 1.0, %v788_v18  ;;  %vm933_vm4 = vcmp.lt.s32.totalorder %v3147_v1, 0  ;;  %v934_v16 = vsub.s32 0, %v3147_v1 }
 0x15a   : > { %v1016_v5 = vor.u32 %v1015_v49, %v1014_v10  ;;  %v1156_v12 = vshrl.u32 %v1155_v32, 23  ;;  %v954_v9 = vsub.s32 4, %v3128_v22  ;;  %v1001_v7 = vshrl.u32 %v2433_v35, %v1000_v4 }
 0x15b   : > { %v790_v61 = vmul.f32 %v789_v2, %v774_v17  ;;  %v799_v23 = vxor.u32 2147483648, %v782_v45  ;;  %v935_v11 = vsel %vm933_vm4, %v934_v16, %v3147_v1  ;;  %vm1018_vm7 = vcmp.lt.s32.totalorder %v3141_v39, 2 }
 0x15c   : > { %v936_v46 = vclz %v935_v11  ;;  %vm1019_vm8 = vcmp.lt.s32.totalorder %v3141_v39, 3  ;;  %vm1020_vm9 = vcmp.lt.s32.totalorder %v3141_v39, 4  ;;  %v1025_v17 = vsel %vm1017_vm6, %v1004_v30, %v1007_v33 }
 0x15d   : > { %v796_v29 = vxor.u32 2147483648, %v790_v61  ;;  %v800_v14 = vsel %vm798_vm1, %v799_v23, %v790_v61  ;;  %v1026_v55 = vsel %vm1020_vm9, %v1013_v20, 920167782  ;;  %v1029_v4 = vsel %vm1017_vm6, %v1007_v33, %v1010_v21 }
 0x15e   : > { %v2239_v63 = vadd.s32 4294967294, %v936_v46  ;;  %v1027_v53 = vsel %vm1019_vm8, %v1010_v21, %v1026_v55  ;;  %v1030_v32 = vsel %vm1020_vm9, %v1016_v5, 1326507024  ;;  %v1022_v3 = vsel %vm1020_vm9, %v1010_v21, 2102212464 }
 0x15f   : > { %v797_v51 = vsel %vm795_vm0, %v782_v45, %v796_v29  ;;  %v1028_v40 = vsel %vm1018_vm7, %v1025_v17, %v1027_v53  ;;  %v1031_v8 = vsel %vm1019_vm8, %v1013_v20, %v1030_v32  ;;  %vm3193_vm11 = vcmp.le.f32.partialorder %v830_v19, 0.7853982 }
 0x160   : > { %v801_v56 = vsel %vm794_vm2, %v797_v51, %v800_v14  ;;  %vm2240_vm10 = vcmp.lt.s32.totalorder %v2239_v63, 0  ;;  %v1032_v18 = vsel %vm1018_vm7, %v1029_v4, %v1031_v8  ;;  %v1058_v34 = vand.u32 65535, %v1028_v40 }
 0x161   : > { %v802_v13 = vsel %vm791_vm3, nan, %v801_v56  ;;  %v939_v52 = vsel %vm2240_vm10, 0, %v2239_v63  ;;  %v1059_v48 = vshrl.u32 %v1028_v40, 16  ;;  %v1036_v49 = vand.u32 65535, %v1032_v18 }
 0x162   : > { %v806_v26 = vrot.slane %v802_v13, 6  ;;  %v940_v59 = vsub.s32 32, %v939_v52  ;;  %v944_v31 = vsub.s32 4294967266, %v939_v52  ;;  %v941_v27 = vshll.u32 %v3147_v1, %v939_v52 }
 0x163   : > { %v1037_v45 = vshrl.u32 %v1032_v18, 16  ;;  %v955_v1 = vsel %vm832_vm5, %v954_v9, %v3128_v22  ;;  %v1061_v2 = vmul.u32 %v1059_v48, %v3134_v28  ;;  %v2244_v16 = vadd.s32 4294967169, %v1156_v12 }
 0x164   : > { %810 = vst [vmem:[%s2878_s29 + $0x28] sm:$0xfc] %v806_v26  ;;  %v942_v36 = vshrl.u32 %v3131_v24, %v940_v59  ;;  %v945_v54 = vadd.s32 127, %v944_v31  ;;  %v3204_v21 = vand.u32 8388607, %v1152_v42  ;;  %v1021_v61 = vsel %vm1017_vm6, %v1001_v7, %v1004_v30 }
 0x165   : > { %v1039_v24 = vmul.u32 %v1037_v45, %v3134_v28  ;;  %v1023_v23 = vsel %vm1019_vm8, %v1007_v33, %v1022_v3  ;;  %v1040_v11 = vmul.u32 %v1036_v49, %v3137_v58  ;;  %v1062_v22 = vmul.u32 %v1058_v34, %v3137_v58 }
 0x166   : > { %v943_v19 = vor.u32 %v942_v36, %v941_v27  ;;  %v946_v10 = vshll.u32 %v945_v54, 23  ;;  %v1064_v20 = vshll.u32 %v1061_v2, 16  ;;  %v1038_v5 = vmul.u32 %v1036_v49, %v3134_v28 }
 0x167   : > { %v1042_v12 = vshll.u32 %v1039_v24, 16  ;;  %v1060_v29 = vmul.u32 %v1058_v34, %v3134_v28  ;;  %v1041_v63 = vmul.u32 %v1037_v45, %v3137_v58  ;;  %v1044_v30 = vshll.u32 %v1040_v11, 16 }
 0x168   : > { %v947_v46 = vor.u32 4788187, %v946_v10  ;;  %v950_v9 = vcvt.s32.f32 %v943_v19  ;;  %v1063_v7 = vmul.u32 %v1059_v48, %v3137_v58  ;;  %v1066_v14 = vshll.u32 %v1062_v22, 16 }
 0x169   : > { %vm1046_vm13 = vc.u32 %v1038_v5, %v1042_v12  ;;  %v1048_v33 = vadd.s32 %v1042_v12, %v1038_v5  ;;  %vm1068_vm14 = vc.u32 %v1060_v29, %v1064_v20  ;;  %v1070_v4 = vadd.s32 %v1064_v20, %v1060_v29 }
 0x16a   : > { %v948_v17 = vand.u32 2147483647, %v947_v46  ;;  %v1047_v51 = vsel %vm1046_vm13, 1, %v2432_v0  ;;  %v1069_v55 = vsel %vm1068_vm14, 1, %v2432_v0  ;;  %v957_v32 = vsel %vm3193_vm11, 0, %v955_v1 }
 0x16b   : > { %v1049_v53 = vadd.s32 %v1047_v51, %v1041_v63  ;;  %vm1050_vm15 = vc.u32 %v1048_v33, %v1044_v30  ;;  %v1071_v28 = vadd.s32 %v1069_v55, %v1063_v7  ;;  %vm1072_vm0 = vc.u32 %v1070_v4, %v1066_v14 }
 0x16c   : > { %v951_v56 = vmul.f32 %v950_v9, %v948_v17  ;;  %v1051_v13 = vsel %vm1050_vm15, 1, %v2432_v0  ;;  %v1162_v58 = vadd.s32 1, %v2244_v16  ;;  %v1043_v40 = vshrl.u32 %v1039_v24, 16 }
 0x16d   : > { %v1053_v8 = vadd.s32 %v1051_v13, %v1049_v53  ;;  %v1073_v26 = vsel %vm1072_vm0, 1, %v2432_v0  ;;  %v1024_v59 = vsel %vm1018_vm7, %v1021_v61, %v1023_v23  ;;  %v1065_v31 = vshrl.u32 %v1061_v2, 16 }
 0x16e   : > { %v952_v52 = vxor.u32 2147483648, %v951_v56  ;;  %v1075_v3 = vadd.s32 %v1073_v26, %v1071_v28  ;;  %vm1163_vm1 = vcmp.gt.s32.totalorder %v1162_v58, 0  ;;  %v1045_v18 = vshrl.u32 %v1040_v11, 16 }
 0x16f   : > { %v1054_v34 = vadd.s32 %v1053_v8, %v1043_v40  ;;  %v1164_v48 = vsel %vm1163_vm1, %v1162_v58, 0  ;;  %v1067_v54 = vshrl.u32 %v1062_v22, 16  ;;  %v3232_v39 = vadd.s32 %v1070_v4, %v1066_v14 }
 0x170   : > { %v953_v27 = vsel %vm832_vm5, %v952_v52, %v951_v56  ;;  %v1076_v49 = vadd.s32 %v1075_v3, %v1065_v31  ;;  %v1166_v45 = vand.u32 31, %v1164_v48  ;;  %v974_v2 = vadd.s32 3, %v957_v32 }
 0x171   : > { %v956_v36 = vsel %vm3193_vm11, %v2923_v62, %v953_v27  ;;  %v3230_v16 = vadd.s32 %v1054_v34, %v1045_v18  ;;  %v1078_v23 = vmul.u32 %v3126_v43, %v1024_v59  ;;  %v1160_v11 = vor.u32 8388608, %v3204_v21 }
 0x172   : > { %v958_v1 = vmul.f32 %v956_v36, %v956_v36  ;;  %v1077_v19 = vadd.s32 %v1076_v49, %v1067_v54  ;;  %v3234_v10 = vsub.s32 32, %v1166_v45  ;;  %v3240_v22 = vshrl.u32 %v1164_v48, 5 }
 0x173   : > { %vm1080_vm2 = vc.u32 %v3230_v16, %v3232_v39  ;;  %v1169_v12 = vshll.u32 %v2433_v35, %v1166_v45  ;;  %v1172_v43 = vshll.u32 %v2434_v37, %v1166_v45  ;;  %v1175_v63 = vshll.u32 %v2435_v41, %v1166_v45 }
 0x174   : > { %v959_v61 = vmul.f32 -0.001358992, %v958_v1  ;;  %v966_v24 = vmul.f32 -0.00019511016, %v958_v1  ;;  %v1081_v57 = vadd.s32 1, %v1077_v19  ;;  %v1170_v20 = vshrl.u32 %v2434_v37, %v3234_v10 }
 0x175   : > { %v1173_v29 = vshrl.u32 %v2435_v41, %v3234_v10  ;;  %v1176_v21 = vshrl.u32 %v2436_v44, %v3234_v10  ;;  %v1178_v51 = vshll.u32 %v2436_v44, %v1166_v45  ;;  %v1179_v14 = vshrl.u32 %v2437_v47, %v3234_v10 }
 0x176   : > { %v960_v46 = vadd.f32 0.041655596, %v959_v61  ;;  %v967_v5 = vadd.f32 0.008332121, %v966_v24  ;;  %v1082_v9 = vsel %vm1080_vm2, %v1081_v57, %v1077_v19  ;;  %v3251_v33 = vor.u32 %v1170_v20, %v1169_v12 }
 0x177   : > { %v1083_v17 = vadd.s32 %v1082_v9, %v1078_v23  ;;  %v1181_v55 = vshll.u32 %v2437_v47, %v1166_v45  ;;  %v1182_v4 = vshrl.u32 %v2438_v50, %v3234_v10  ;;  %v3259_v32 = vor.u32 %v1173_v29, %v1172_v43 }
 0x178   : > { %v961_v30 = vmul.f32 %v960_v46, %v958_v1  ;;  %v968_v7 = vmul.f32 %v967_v5, %v958_v1  ;;  %v975_v13 = vand.u32 3, %v974_v2  ;;  %v1177_v58 = vor.u32 %v1176_v21, %v1175_v63 }
 0x179   : > { %v1084_v28 = vadd.s32 536870912, %v1083_v17  ;;  %v1180_v52 = vor.u32 %v1179_v14, %v1178_v51  ;;  %v1183_v40 = vor.u32 %v1182_v4, %v1181_v55  ;;  %vm1187_vm3 = vcmp.lt.s32.totalorder %v3240_v22, 4 }
 0x17a   : > { %v962_v56 = vadd.f32 -0.4999988, %v961_v30  ;;  %v969_v53 = vadd.f32 -0.16666654, %v968_v7  ;;  %vm1184_vm4 = vcmp.lt.s32.totalorder %v3240_v22, 1  ;;  %vm1186_vm5 = vcmp.lt.s32.totalorder %v3240_v22, 3 }
 0x17b   : > { %v3261_v59 = vshrl.u32 %v1084_v28, 30  ;;  %v1193_v31 = vsel %vm1187_vm3, %v1180_v52, 920167782  ;;  %v3268_v3 = vshll.u32 %v1160_v11, 8  ;;  %v1192_v48 = vsel %vm1184_vm4, %v3251_v33, %v3259_v32 }
 0x17c   : > { %v963_v8 = vmul.f32 %v962_v56, %v958_v1  ;;  %v970_v26 = vmul.f32 %v969_v53, %v958_v1  ;;  %vm976_vm6 = vcmp.lt.s32.totalorder %v975_v13, 2  ;;  %vm1185_vm7 = vcmp.lt.s32.totalorder %v3240_v22, 2 }
 0x17d   : > { %v1086_v34 = vshll.u32 %v3261_v59, 30  ;;  %v1194_v54 = vsel %vm1186_vm5, %v1177_v58, %v1193_v31  ;;  %v1197_v49 = vsel %vm1187_vm3, %v1183_v40, 1326507024  ;;  %v1196_v19 = vsel %vm1184_vm4, %v3259_v32, %v1177_v58 }
 0x17e   : > { %v964_v27 = vadd.f32 1.0, %v963_v8  ;;  %v971_v18 = vadd.f32 1.0, %v970_v26  ;;  %vm977_vm8 = vcmp.eq.s32.totalorder %v975_v13, 0  ;;  %vm980_vm9 = vcmp.eq.s32.totalorder %v975_v13, 2 }
 0x17f   : > { %v1087_v2 = vsub.s32 %v1083_v17, %v1086_v34  ;;  %v1195_v61 = vsel %vm1185_vm7, %v1192_v48, %v1194_v54  ;;  %v1198_v24 = vsel %vm1186_vm5, %v1180_v52, %v1197_v49  ;;  %v1201_v11 = vand.u32 65535, %v3268_v3 }
 0x180   : > { %v972_v45 = vmul.f32 %v971_v18, %v956_v36  ;;  %v981_v1 = vxor.u32 2147483648, %v964_v27  ;;  %v1199_v20 = vsel %vm1185_vm7, %v1196_v19, %v1198_v24  ;;  %v1202_v46 = vshrl.u32 %v3268_v3, 16 }
 0x181   : > { %vm1088_vm10 = vcmp.lt.s32.totalorder %v1087_v2, 0  ;;  %v1089_v57 = vsub.s32 0, %v1087_v2  ;;  %v1225_v5 = vand.u32 65535, %v1195_v61  ;;  %v1203_v9 = vand.u32 65535, %v1199_v20 }
 0x182   : > { %v978_v23 = vxor.u32 2147483648, %v972_v45  ;;  %v982_v36 = vsel %vm980_vm9, %v981_v1, %v972_v45  ;;  %v1204_v43 = vshrl.u32 %v1199_v20, 16  ;;  %vm973_vm11 = vweird.f32 %v2923_v62 }
 0x183   : > { %v1090_v29 = vsel %vm1088_vm10, %v1089_v57, %v1087_v2  ;;  %v1226_v30 = vshrl.u32 %v1195_v61, 16  ;;  %v1079_v7 = vadd.s32 %v3232_v39, %v3230_v16  ;;  %v3296_v17 = vadd.f32 1.5707964, %v3013_v38 }
 0x184   : > { %v979_v12 = vsel %vm977_vm8, %v964_v27, %v978_v23  ;;  %v1091_v21 = vclz %v1090_v29  ;;  %v1206_v51 = vmul.u32 %v1204_v43, %v1201_v11  ;;  %v1207_v14 = vmul.u32 %v1203_v9, %v1202_v46 }
 0x185   : > { %v983_v63 = vsel %vm976_vm6, %v979_v12, %v982_v36  ;;  %v1109_v4 = vsub.s32 4, %v3261_v59  ;;  %v1168_v56 = vshrl.u32 %v2433_v35, %v3234_v10  ;;  %v1189_v62 = vsel %vm1187_vm3, %v1177_v58, 2102212464 }
 0x186   : > { %v2242_v55 = vadd.s32 4294967294, %v1091_v21  ;;  %v984_v53 = vsel %vm973_vm11, nan, %v983_v63  ;;  %v1205_v28 = vmul.u32 %v1203_v9, %v1201_v11  ;;  %v1209_v13 = vshll.u32 %v1206_v51, 16 }
 0x187   : > { %v1227_v52 = vmul.u32 %v1225_v5, %v1201_v11  ;;  %v1208_v16 = vmul.u32 %v1204_v43, %v1202_v46  ;;  %v1211_v39 = vshll.u32 %v1207_v14, 16  ;;  %v1228_v40 = vmul.u32 %v1226_v30, %v1201_v11 }
 0x188   : > { %vm2243_vm13 = vcmp.lt.s32.totalorder %v2242_v55, 0  ;;  %vm987_vm14 = vcmp.lt.s32.totalorder %v3013_v38, 0  ;;  %vm1213_vm15 = vc.u32 %v1205_v28, %v1209_v13  ;;  %v1215_v26 = vadd.s32 %v1209_v13, %v1205_v28 }
 0x189   : > { %v1094_v8 = vsel %vm2243_vm13, 0, %v2242_v55  ;;  %v1229_v31 = vmul.u32 %v1225_v5, %v1202_v46  ;;  %v1210_v10 = vshrl.u32 %v1206_v51, 16  ;;  %v1214_v34 = vsel %vm1213_vm15, 1, %v2432_v0 }
 0x18a   : > { %v1095_v27 = vsub.s32 32, %v1094_v8  ;;  %v1099_v18 = vsub.s32 4294967266, %v1094_v8  ;;  %v1216_v58 = vadd.s32 %v1214_v34, %v1208_v16  ;;  %vm1217_vm0 = vc.u32 %v1215_v26, %v1211_v39 }
 0x18b   : > { %v1230_v48 = vmul.u32 %v1226_v30, %v1202_v46  ;;  %v1231_v54 = vshll.u32 %v1228_v40, 16  ;;  %v1096_v49 = vshll.u32 %v1087_v2, %v1094_v8  ;;  %v1218_v19 = vsel %vm1217_vm0, 1, %v2432_v0 }
 0x18c   : > { %v1097_v45 = vshrl.u32 %v1079_v7, %v1095_v27  ;;  %v1100_v1 = vadd.s32 127, %v1099_v18  ;;  %v1220_v61 = vadd.s32 %v1218_v19, %v1216_v58  ;;  %v1233_v24 = vshll.u32 %v1229_v31, 16 }
 0x18d   : > { %vm1235_vm1 = vc.u32 %v1227_v52, %v1231_v54  ;;  %v1237_v23 = vadd.s32 %v1231_v54, %v1227_v52  ;;  %v1142_v36 = vrot.slane %v984_v53, 2  ;;  %v1307_v2 = vand.u32 2147483647, %v3296_v17 }
 0x18e   : > { %v1098_v57 = vor.u32 %v1097_v45, %v1096_v49  ;;  %v1101_v11 = vshll.u32 %v1100_v1, 23  ;;  %v1236_v20 = vsel %vm1235_vm1, 1, %v2432_v0  ;;  %v1221_v5 = vadd.s32 %v1220_v61, %v1210_v10 }
 0x18f   : > { %v1238_v12 = vadd.s32 %v1236_v20, %v1230_v48  ;;  %vm1239_vm2 = vc.u32 %v1237_v23, %v1233_v24  ;;  %1146 = vst [vmem:[%s2878_s29] sm:$0xc0] %v1142_v36  ;;  %v1188_v29 = vsel %vm1184_vm4, %v1168_v56, %v3251_v33  ;;  %v1212_v9 = vshrl.u32 %v1207_v14, 16 }
 0x190   : > { %v1102_v46 = vor.u32 4788187, %v1101_v11  ;;  %v1240_v43 = vsel %vm1239_vm2, 1, %v2432_v0  ;;  %1148 = vst [vmem:[%s2878_s29 + $0x10] sm:$0xf] %v1142_v36  ;;  %v1190_v63 = vsel %vm1186_vm5, %v3259_v32, %v1189_v62  ;;  %v1232_v21 = vshrl.u32 %v1228_v40, 16 }
 0x191   : > { %v1242_v30 = vadd.s32 %v1240_v43, %v1238_v12  ;;  %v1310_v7 = vand.u32 2139095040, %v3296_v17  ;;  %v1105_v55 = vcvt.s32.f32 %v1098_v57  ;;  %v1110_v53 = vsel %vm987_vm14, %v1109_v4, %v3261_v59  ;;  %v2252_v32 = vld [vmem:[%s2547_s26 + $0x2] ss:$4 sm:$0x3] }
 0x192   : > { %v1103_v51 = vand.u32 2147483647, %v1102_v46  ;;  %v1222_v33 = vadd.s32 %v1221_v5, %v1212_v9  ;;  %v1234_v14 = vshrl.u32 %v1229_v31, 16  ;;  %v1314_v13 = vand.u32 8388607, %v1307_v2 }
 0x193   : > { %v1243_v56 = vadd.s32 %v1242_v30, %v1232_v21  ;;  %v1311_v28 = vshrl.u32 %v1310_v7, 23  ;;  %v1241_v16 = vadd.s32 %v1237_v23, %v1233_v24  ;;  %vm3326_vm3 = vcmp.le.f32.partialorder %v985_v25, 0.7853982 }
 0x194   : > { %v1106_v52 = vmul.f32 %v1105_v55, %v1103_v51  ;;  %v1191_v39 = vsel %vm1185_vm7, %v1188_v29, %v1190_v63  ;;  %v1112_v8 = vsel %vm3326_vm3, 0, %v1110_v53  ;;  %v1315_v31 = vor.u32 8388608, %v1314_v13 }
 0x195   : > { %v1244_v59 = vadd.s32 %v1243_v56, %v1234_v14  ;;  %v2247_v4 = vadd.s32 4294967169, %v1311_v28  ;;  %vm1247_vm4 = vc.u32 %v1222_v33, %v1241_v16  ;;  %v3334_v18 = vmul.f32 6.2831855, %v2252_v32 }
 0x196   : > { %v1107_v40 = vxor.u32 2147483648, %v1106_v52  ;;  %v1245_v10 = vmul.u32 %v3268_v3, %v1191_v39  ;;  %v1129_v48 = vadd.s32 3, %v1112_v8  ;;  %v3342_v1 = vshll.u32 %v1315_v31, 8 }
 0x197   : > { %v1248_v26 = vadd.s32 1, %v1244_v59  ;;  %v1317_v27 = vadd.s32 1, %v2247_v4  ;;  %v1473_v19 = vperm.slane %v3334_v18, 0  ;;  %v3349_v5 = vadd.s32 %v1241_v16, %v1222_v33 }
 0x198   : > { %v1108_v25 = vsel %vm987_vm14, %v1107_v40, %v1106_v52  ;;  %v3347_v36 = vand.u32 3, %v1129_v48  ;;  %v3352_v12 = vand.u32 65535, %v3342_v1  ;;  %v1474_v46 = vperm.slane %v3334_v18, 1 }
 0x199   : > { %v1111_v22 = vsel %vm3326_vm3, %v3013_v38, %v1108_v25  ;;  %v1249_v34 = vsel %vm1247_vm4, %v1248_v26, %v1244_v59  ;;  %vm1318_vm5 = vcmp.gt.s32.totalorder %v1317_v27, 0  ;;  %v3356_v29 = vmul.f32 %v1473_v19, %v2558_v6 }
 0x19a   : > { %v1113_v58 = vmul.f32 %v1111_v22, %v1111_v22  ;;  %v1250_v54 = vadd.s32 %v1249_v34, %v1245_v10  ;;  %v1319_v49 = vsel %vm1318_vm5, %v1317_v27, 0  ;;  %vm1154_vm6 = vcmp.lt.s32.totalorder %v3124_v60, 0 }
 0x19b   : > { %v1321_v45 = vand.u32 31, %v1319_v49  ;;  %v3359_v21 = vshrl.u32 %v1319_v49, 5  ;;  %vm1135_vm7 = vcmp.eq.s32.totalorder %v3347_v36, 2  ;;  %vm1132_vm8 = vcmp.eq.s32.totalorder %v3347_v36, 0 }
 0x19c   : > { %v1114_v61 = vmul.f32 -0.001358992, %v1113_v58  ;;  %v1121_v24 = vmul.f32 -0.00019511016, %v1113_v58  ;;  %v1251_v23 = vadd.s32 536870912, %v1250_v54  ;;  %vm1131_vm9 = vcmp.lt.s32.totalorder %v3347_v36, 2 }
 0x19d   : > { %v3345_v57 = vsub.s32 32, %v1321_v45  ;;  %v1324_v30 = vshll.u32 %v2433_v35, %v1321_v45  ;;  %v1327_v56 = vshll.u32 %v2434_v37, %v1321_v45  ;;  %v1330_v28 = vshll.u32 %v2435_v41, %v1321_v45 }
 0x19e   : > { %v1115_v3 = vadd.f32 0.041655596, %v1114_v61  ;;  %v1122_v11 = vadd.f32 0.008332121, %v1121_v24  ;;  %v1252_v20 = vshrl.u32 %v1251_v23, 30  ;;  %v1333_v52 = vshll.u32 %v2436_v44, %v1321_v45 }
 0x19f   : > { %v1325_v7 = vshrl.u32 %v2434_v37, %v3345_v57  ;;  %v1328_v51 = vshrl.u32 %v2435_v41, %v3345_v57  ;;  %v1334_v55 = vshrl.u32 %v2437_v47, %v3345_v57  ;;  %v1331_v13 = vshrl.u32 %v2436_v44, %v3345_v57 }
 0x1a0   : > { %v1116_v9 = vmul.f32 %v1115_v3, %v1113_v58  ;;  %v1123_v43 = vmul.f32 %v1122_v11, %v1113_v58  ;;  %v1253_v63 = vshll.u32 %v1252_v20, 30  ;;  %v1337_v16 = vshrl.u32 %v2438_v50, %v3345_v57 }
 0x1a1   : > { %vm1128_vm11 = vweird.f32 %v3013_v38  ;;  %v1276_v59 = vsub.s32 4, %v1252_v20  ;;  %v3383_v4 = vor.u32 %v1325_v7, %v1324_v30  ;;  %v3385_v40 = vor.u32 %v1328_v51, %v1327_v56 }
 0x1a2   : > { %v1117_v53 = vadd.f32 -0.4999988, %v1116_v9  ;;  %v1124_v33 = vadd.f32 -0.16666654, %v1123_v43  ;;  %v3369_v14 = vsub.s32 %v1250_v54, %v1253_v63  ;;  %v1335_v8 = vor.u32 %v1334_v55, %v1333_v52 }
 0x1a3   : > { %v1336_v25 = vshll.u32 %v2437_v47, %v1321_v45  ;;  %v3389_v34 = vor.u32 %v1331_v13, %v1330_v28  ;;  %v1479_v48 = vand.u32 2147483647, %v3356_v29  ;;  %vm1339_vm13 = vcmp.lt.s32.totalorder %v3359_v21, 1 }
 0x1a4   : > { %v1118_v32 = vmul.f32 %v1117_v53, %v1113_v58  ;;  %v1125_v62 = vmul.f32 %v1124_v33, %v1113_v58  ;;  %vm1255_vm10 = vcmp.lt.s32.totalorder %v3369_v14, 0  ;;  %v1256_v39 = vsub.s32 0, %v3369_v14 }
 0x1a5   : > { %v1357_v58 = vshrl.u32 %v3342_v1, 16  ;;  %v1338_v19 = vor.u32 %v1337_v16, %v1336_v25  ;;  %vm3396_vm14 = vcmp.le.f32.partialorder %v1152_v42, 0.7853982  ;;  %v3402_v45 = vsel %vm1154_vm6, %v1276_v59, %v1252_v20 }
 0x1a6   : > { %v1119_v26 = vadd.f32 1.0, %v1118_v32  ;;  %v1126_v31 = vadd.f32 1.0, %v1125_v62  ;;  %v1257_v27 = vsel %vm1255_vm10, %v1256_v39, %v3369_v14  ;;  %vm1342_vm15 = vcmp.lt.s32.totalorder %v3359_v21, 4 }
 0x1a7   : > { %v1258_v10 = vclz %v1257_v27  ;;  %vm1340_vm0 = vcmp.lt.s32.totalorder %v3359_v21, 2  ;;  %vm1341_vm1 = vcmp.lt.s32.totalorder %v3359_v21, 3  ;;  %v1348_v42 = vsel %vm1342_vm15, %v1335_v8, 920167782 }
 0x1a8   : > { %v1127_v54 = vmul.f32 %v1126_v31, %v1111_v22  ;;  %v1136_v49 = vxor.u32 2147483648, %v1119_v26  ;;  %v1347_v22 = vsel %vm1339_vm13, %v3383_v4, %v3385_v40  ;;  %v1349_v11 = vsel %vm1341_vm1, %v3389_v34, %v1348_v42 }
 0x1a9   : > { %v2245_v24 = vadd.s32 4294967294, %v1258_v10  ;;  %v1351_v20 = vsel %vm1339_vm13, %v3385_v40, %v3389_v34  ;;  %v1350_v63 = vsel %vm1340_vm0, %v1347_v22, %v1349_v11  ;;  %v1352_v30 = vsel %vm1342_vm15, %v1338_v19, 1326507024 }
 0x1aa   : > { %v1133_v23 = vxor.u32 2147483648, %v1127_v54  ;;  %v1137_v3 = vsel %vm1135_vm7, %v1136_v49, %v1127_v54  ;;  %v1353_v56 = vsel %vm1341_vm1, %v1335_v8, %v1352_v30  ;;  %v1380_v28 = vand.u32 65535, %v1350_v63 }
 0x1ab   : > { %vm2246_vm2 = vcmp.lt.s32.totalorder %v2245_v24, 0  ;;  %v1381_v13 = vshrl.u32 %v1350_v63, 16  ;;  %v1354_v36 = vsel %vm1340_vm0, %v1351_v20, %v1353_v56  ;;  %v1482_v38 = vand.u32 2139095040, %v3356_v29 }
 0x1ac   : > { %v1134_v9 = vsel %vm1132_vm8, %v1119_v26, %v1133_v23  ;;  %v1261_v43 = vsel %vm2246_vm2, 0, %v2245_v24  ;;  %v1358_v62 = vand.u32 65535, %v1354_v36  ;;  %v1359_v39 = vshrl.u32 %v1354_v36, 16 }
 0x1ad   : > { %v1138_v7 = vsel %vm1131_vm9, %v1134_v9, %v1137_v3  ;;  %v1262_v51 = vsub.s32 32, %v1261_v43  ;;  %v1263_v55 = vshll.u32 %v3369_v14, %v1261_v43  ;;  %v1266_v53 = vsub.s32 4294967266, %v1261_v43 }
 0x1ae   : > { %v1139_v33 = vsel %vm1128_vm11, nan, %v1138_v7  ;;  %v1383_v14 = vmul.u32 %v1381_v13, %v3352_v12  ;;  %v1384_v8 = vmul.u32 %v1380_v28, %v1357_v58  ;;  %v3443_v31 = vand.u32 8388607, %v1479_v48 }
 0x1af   : > { %v1143_v52 = vrot.slane %v1139_v33, 2  ;;  %v1264_v16 = vshrl.u32 %v3349_v5, %v1262_v51  ;;  %v1267_v32 = vadd.s32 127, %v1266_v53  ;;  %v1279_v5 = vsel %vm3396_vm14, 0, %v3402_v45 }
 0x1b0   : > { %v1323_v27 = vshrl.u32 %v2433_v35, %v3345_v57  ;;  %v1361_v25 = vmul.u32 %v1359_v39, %v3352_v12  ;;  %v1362_v10 = vmul.u32 %v1358_v62, %v1357_v58  ;;  %v1382_v49 = vmul.u32 %v1380_v28, %v3352_v12 }
 0x1b1   : > { %1147 = vst [vmem:[%s2878_s29 + $0x8] sm:$0xc0] %v1143_v52  ;;  %v1265_v59 = vor.u32 %v1264_v16, %v1263_v55  ;;  %v1268_v26 = vshll.u32 %v1267_v32, 23  ;;  %v1385_v19 = vmul.u32 %v1381_v13, %v1357_v58  ;;  %v1386_v24 = vshll.u32 %v1383_v14, 16 }
 0x1b2   : > { %1149 = vst [vmem:[%s2878_s29 + $0x18] sm:$0xf] %v1143_v52  ;;  %v1360_v23 = vmul.u32 %v1358_v62, %v3352_v12  ;;  %v1363_v42 = vmul.u32 %v1359_v39, %v1357_v58  ;;  %v1364_v3 = vshll.u32 %v1361_v25, 16  ;;  %v1366_v20 = vshll.u32 %v1362_v10, 16 }
 0x1b3   : > { %v1269_v54 = vor.u32 4788187, %v1268_v26  ;;  %v1272_v22 = vcvt.s32.f32 %v1265_v59  ;;  %v1388_v9 = vshll.u32 %v1384_v8, 16  ;;  %vm1390_vm3 = vc.u32 %v1382_v49, %v1386_v24 }
 0x1b4   : > { %vm1368_vm4 = vc.u32 %v1360_v23, %v1364_v3  ;;  %v1370_v45 = vadd.s32 %v1364_v3, %v1360_v23  ;;  %v1391_v57 = vsel %vm1390_vm3, 1, %v2432_v0  ;;  %v1392_v43 = vadd.s32 %v1386_v24, %v1382_v49 }
 0x1b5   : > { %v1270_v11 = vand.u32 2147483647, %v1269_v54  ;;  %v1343_v30 = vsel %vm1339_vm13, %v1323_v27, %v3383_v4  ;;  %v1369_v7 = vsel %vm1368_vm4, 1, %v2432_v0  ;;  %v1393_v51 = vadd.s32 %v1391_v57, %v1385_v19 }
 0x1b6   : > { %v1344_v12 = vsel %vm1342_vm15, %v3389_v34, 2102212464  ;;  %v1371_v58 = vadd.s32 %v1369_v7, %v1363_v42  ;;  %vm1372_vm5 = vc.u32 %v1370_v45, %v1366_v20  ;;  %vm1394_vm7 = vc.u32 %v1392_v43, %v1388_v9 }
 0x1b7   : > { %v1273_v63 = vmul.f32 %v1272_v22, %v1270_v11  ;;  %v1373_v53 = vsel %vm1372_vm5, 1, %v2432_v0  ;;  %v1395_v33 = vsel %vm1394_vm7, 1, %v2432_v0  ;;  %v1483_v56 = vshrl.u32 %v1482_v38, 23 }
 0x1b8   : > { %v1365_v28 = vshrl.u32 %v1361_v25, 16  ;;  %v1375_v13 = vadd.s32 %v1373_v53, %v1371_v58  ;;  %v1387_v52 = vshrl.u32 %v1383_v14, 16  ;;  %v1397_v4 = vadd.s32 %v1395_v33, %v1393_v51 }
 0x1b9   : > { %v1274_v55 = vxor.u32 2147483648, %v1273_v63  ;;  %v1345_v34 = vsel %vm1341_vm1, %v3385_v40, %v1344_v12  ;;  %v1367_v32 = vshrl.u32 %v1362_v10, 16  ;;  %v2253_v36 = vadd.s32 4294967169, %v1483_v56 }
 0x1ba   : > { %v1376_v39 = vadd.s32 %v1375_v13, %v1365_v28  ;;  %v1389_v59 = vshrl.u32 %v1384_v8, 16  ;;  %v1398_v38 = vadd.s32 %v1397_v4, %v1387_v52  ;;  %v1296_v27 = vadd.s32 3, %v1279_v5 }
 0x1bb   : > { %v1275_v16 = vsel %vm1154_vm6, %v1274_v55, %v1273_v63  ;;  %v1489_v14 = vadd.s32 1, %v2253_v36  ;;  %v1346_v25 = vsel %vm1340_vm0, %v1343_v30, %v1345_v34  ;;  %v3476_v49 = vadd.s32 %v1392_v43, %v1388_v9 }
 0x1bc   : > { %v1278_v62 = vsel %vm3396_vm14, %v3124_v60, %v1275_v16  ;;  %v3474_v54 = vadd.s32 %v1376_v39, %v1367_v32  ;;  %v1399_v40 = vadd.s32 %v1398_v38, %v1389_v59  ;;  %v3481_v61 = vmul.f32 %v1474_v46, %v2558_v6 }
 0x1bd   : > { %v1280_v26 = vmul.f32 %v1278_v62, %v1278_v62  ;;  %vm1490_vm6 = vcmp.gt.s32.totalorder %v1489_v14, 0  ;;  %v1487_v21 = vor.u32 8388608, %v3443_v31  ;;  %v1400_v23 = vmul.u32 %v3342_v1, %v1346_v25 }
 0x1be   : > { %vm1402_vm8 = vc.u32 %v3474_v54, %v3476_v49  ;;  %v1403_v8 = vadd.s32 1, %v1399_v40  ;;  %v1491_v5 = vsel %vm1490_vm6, %v1489_v14, 0  ;;  %v1297_v3 = vand.u32 3, %v1296_v27 }
 0x1bf   : > { %v1281_v10 = vmul.f32 -0.001358992, %v1280_v26  ;;  %v1288_v19 = vmul.f32 -0.00019511016, %v1280_v26  ;;  %v1493_v42 = vand.u32 31, %v1491_v5  ;;  %v3487_v46 = vshll.u32 %v1487_v21, 8 }
 0x1c0   : > { %v1404_v11 = vsel %vm1402_vm8, %v1403_v8, %v1399_v40  ;;  %v1634_v45 = vand.u32 2147483647, %v3481_v61  ;;  %v1637_v31 = vand.u32 2139095040, %v3481_v61  ;;  %vm1299_vm9 = vcmp.eq.s32.totalorder %v1297_v3, 0 }
 0x1c1   : > { %v1282_v24 = vadd.f32 0.041655596, %v1281_v10  ;;  %v1289_v22 = vadd.f32 0.008332121, %v1288_v19  ;;  %v1405_v18 = vadd.s32 %v1404_v11, %v1400_v23  ;;  %v1494_v6 = vsub.s32 32, %v1493_v42 }
 0x1c2   : > { %vm1302_vm10 = vcmp.eq.s32.totalorder %v1297_v3, 2  ;;  %v3491_v30 = vshrl.u32 %v1491_v5, 5  ;;  %vm1298_vm11 = vcmp.lt.s32.totalorder %v1297_v3, 2  ;;  %vm1295_vm13 = vweird.f32 %v3124_v60 }
 0x1c3   : > { %v1283_v20 = vmul.f32 %v1282_v24, %v1280_v26  ;;  %v1290_v9 = vmul.f32 %v1289_v22, %v1280_v26  ;;  %v1406_v63 = vadd.s32 536870912, %v1405_v18  ;;  %v1497_v1 = vshrl.u32 %v2434_v37, %v1494_v6 }
 0x1c4   : > { %v1500_v7 = vshrl.u32 %v2435_v41, %v1494_v6  ;;  %v1506_v51 = vshrl.u32 %v2437_v47, %v1494_v6  ;;  %v1503_v53 = vshrl.u32 %v2436_v44, %v1494_v6  ;;  %v1496_v33 = vshll.u32 %v2433_v35, %v1493_v42 }
 0x1c5   : > { %v1284_v57 = vadd.f32 -0.4999988, %v1283_v20  ;;  %v1291_v43 = vadd.f32 -0.16666654, %v1290_v9  ;;  %v3496_v55 = vshrl.u32 %v1406_v63, 30  ;;  %v1499_v56 = vshll.u32 %v2434_v37, %v1493_v42 }
 0x1c6   : > { %v1502_v28 = vshll.u32 %v2435_v41, %v1493_v42  ;;  %v1505_v13 = vshll.u32 %v2436_v44, %v1493_v42  ;;  %v1508_v34 = vshll.u32 %v2437_v47, %v1493_v42  ;;  %v1498_v32 = vor.u32 %v1497_v1, %v1496_v33 }
 0x1c7   : > { %v1285_v12 = vmul.f32 %v1284_v57, %v1280_v26  ;;  %v1292_v58 = vmul.f32 %v1291_v43, %v1280_v26  ;;  %v1408_v16 = vshll.u32 %v3496_v55, 30  ;;  %v1501_v36 = vor.u32 %v1500_v7, %v1499_v56 }
 0x1c8   : > { %v1507_v39 = vor.u32 %v1506_v51, %v1505_v13  ;;  %v1509_v59 = vshrl.u32 %v2438_v50, %v1494_v6  ;;  %v1504_v14 = vor.u32 %v1503_v53, %v1502_v28  ;;  %vm1511_vm14 = vcmp.lt.s32.totalorder %v3491_v30, 1 }
 0x1c9   : > { %v1286_v52 = vadd.f32 1.0, %v1285_v12  ;;  %v1293_v4 = vadd.f32 1.0, %v1292_v58  ;;  %v1409_v27 = vsub.s32 %v1405_v18, %v1408_v16  ;;  %v1528_v40 = vand.u32 65535, %v3487_v46 }
 0x1ca   : > { %v1510_v25 = vor.u32 %v1509_v59, %v1508_v34  ;;  %v1638_v10 = vshrl.u32 %v1637_v31, 23  ;;  %vm1309_vm15 = vcmp.lt.s32.totalorder %v3296_v17, 0  ;;  %vm1514_vm1 = vcmp.lt.s32.totalorder %v3491_v30, 4 }
 0x1cb   : > { %v1294_v38 = vmul.f32 %v1293_v4, %v1278_v62  ;;  %v1303_v26 = vxor.u32 2147483648, %v1286_v52  ;;  %vm1410_vm0 = vcmp.lt.s32.totalorder %v1409_v27, 0  ;;  %v1411_v8 = vsub.s32 0, %v1409_v27 }
 0x1cc   : > { %v1495_v21 = vshrl.u32 %v2433_v35, %v1494_v6  ;;  %vm1513_vm2 = vcmp.lt.s32.totalorder %v3491_v30, 3  ;;  %v1519_v62 = vsel %vm1511_vm14, %v1498_v32, %v1501_v36  ;;  %v1520_v5 = vsel %vm1514_vm1, %v1507_v39, 920167782 }
 0x1cd   : > { %v1300_v19 = vxor.u32 2147483648, %v1294_v38  ;;  %v1304_v22 = vsel %vm1302_vm10, %v1303_v26, %v1294_v38  ;;  %v1412_v23 = vsel %vm1410_vm0, %v1411_v8, %v1409_v27  ;;  %v1521_v42 = vsel %vm1513_vm2, %v1504_v14, %v1520_v5 }
 0x1ce   : > { %v1413_v20 = vclz %v1412_v23  ;;  %vm1512_vm3 = vcmp.lt.s32.totalorder %v3491_v30, 2  ;;  %v1516_v9 = vsel %vm1514_vm1, %v1504_v14, 2102212464  ;;  %v1523_v57 = vsel %vm1511_vm14, %v1501_v36, %v1504_v14 }
 0x1cf   : > { %v1301_v24 = vsel %vm1299_vm9, %v1286_v52, %v1300_v19  ;;  %v1522_v6 = vsel %vm1512_vm3, %v1519_v62, %v1521_v42  ;;  %v1524_v43 = vsel %vm1514_vm1, %v1510_v25, 1326507024  ;;  %v1401_v3 = vadd.s32 %v3476_v49, %v3474_v54 }
 0x1d0   : > { %v1305_v11 = vsel %vm1298_vm11, %v1301_v24, %v1304_v22  ;;  %v2248_v63 = vadd.s32 4294967294, %v1413_v20  ;;  %v1431_v31 = vsub.s32 4, %v3496_v55  ;;  %v1529_v1 = vshrl.u32 %v3487_v46, 16  ;;  %v2332_v24 = vld [vmem:[%s2547_s26 + $0x1] ss:$4 sm:$0x3] }
 0x1d1   : > { %v1306_v18 = vsel %vm1295_vm13, nan, %v1305_v11  ;;  %v1515_v60 = vsel %vm1511_vm14, %v1495_v21, %v1498_v32  ;;  %v1525_v7 = vsel %vm1513_vm2, %v1507_v39, %v1524_v43  ;;  %v1553_v51 = vshrl.u32 %v1522_v6, 16 }
 0x1d2   : > { %1462 = vst [vmem:[%s2878_s29 + $0x30] sm:$0x3f] %v1306_v18  ;;  %v2256_v12 = vadd.s32 4294967169, %v1638_v10  ;;  %vm2249_vm4 = vcmp.lt.s32.totalorder %v2248_v63, 0  ;;  %v1517_v58 = vsel %vm1513_vm2, %v1501_v36, %v1516_v9  ;;  %v1526_v54 = vsel %vm1512_vm3, %v1523_v57, %v1525_v7 }
 0x1d3   : > { %v1552_v49 = vand.u32 65535, %v1522_v6  ;;  %v1416_v53 = vsel %vm2249_vm4, 0, %v2248_v63  ;;  %v1530_v33 = vand.u32 65535, %v1526_v54  ;;  %v1531_v56 = vshrl.u32 %v1526_v54, 16 }
 0x1d4   : > { %v3548_v28 = vand.u32 8388607, %v1634_v45  ;;  %v1417_v13 = vsub.s32 32, %v1416_v53  ;;  %v1421_v52 = vsub.s32 4294967266, %v1416_v53  ;;  %v3553_v4 = vsel %vm1309_vm15, %v1431_v31, %v3496_v55 }
 0x1d5   : > { %v1555_v16 = vmul.u32 %v1553_v51, %v1528_v40  ;;  %vm3557_vm5 = vcmp.le.f32.partialorder %v1307_v2, 0.7853982  ;;  %v3563_v32 = vsel %vm1512_vm3, %v1515_v60, %v1517_v58  ;;  %v1533_v36 = vmul.u32 %v1531_v56, %v1528_v40 }
 0x1d6   : > { %v1534_v39 = vmul.u32 %v1530_v33, %v1529_v1  ;;  %v1644_v59 = vadd.s32 1, %v2256_v12  ;;  %v1418_v38 = vshll.u32 %v1409_v27, %v1416_v53  ;;  %v1419_v26 = vshrl.u32 %v1401_v3, %v1417_v13 }
 0x1d7   : > { %v1422_v14 = vadd.s32 127, %v1421_v52  ;;  %v1556_v55 = vmul.u32 %v1552_v49, %v1529_v1  ;;  %v1532_v25 = vmul.u32 %v1530_v33, %v1528_v40  ;;  %v1535_v10 = vmul.u32 %v1531_v56, %v1529_v1 }
 0x1d8   : > { %v1536_v19 = vshll.u32 %v1533_v36, 16  ;;  %v1554_v8 = vmul.u32 %v1552_v49, %v1528_v40  ;;  %v1420_v2 = vor.u32 %v1419_v26, %v1418_v38  ;;  %v1557_v62 = vmul.u32 %v1553_v51, %v1529_v1 }
 0x1d9   : > { %v1423_v21 = vshll.u32 %v1422_v14, 23  ;;  %v1558_v5 = vshll.u32 %v1555_v16, 16  ;;  %v2250_v30 = vadd.f32 -0.5, %v2332_v24  ;;  %v1538_v22 = vshll.u32 %v1534_v39, 16 }
 0x1da   : > { %vm1540_vm7 = vc.u32 %v1532_v25, %v1536_v19  ;;  %v1542_v23 = vadd.s32 %v1536_v19, %v1532_v25  ;;  %v1427_v11 = vcvt.s32.f32 %v1420_v2  ;;  %v1560_v20 = vshll.u32 %v1556_v55, 16 }
 0x1db   : > { %v1424_v42 = vor.u32 4788187, %v1423_v21  ;;  %v1541_v27 = vsel %vm1540_vm7, 1, %v2432_v0  ;;  %v1465_v9 = vmul.f32 2.0, %v2250_v30  ;;  %vm1562_vm8 = vc.u32 %v1554_v8, %v1558_v5 }
 0x1dc   : > { %v1543_v18 = vadd.s32 %v1541_v27, %v1535_v10  ;;  %vm1544_vm6 = vc.u32 %v1542_v23, %v1538_v22  ;;  %v1563_v57 = vsel %vm1562_vm8, 1, %v2432_v0  ;;  %v1564_v43 = vadd.s32 %v1558_v5, %v1554_v8 }
 0x1dd   : > { %v1425_v40 = vand.u32 2147483647, %v1424_v42  ;;  %v1545_v6 = vsel %vm1544_vm6, 1, %v2432_v0  ;;  %2251 = vst.msk [vmem:[%s2878_s29 + $0x45] ss:$8 sm:$0x3] %vm3090_vm12, %v1465_v9  ;;  %v1565_v31 = vadd.s32 %v1563_v57, %v1557_v62  ;;  %v1572_v56 = vmul.u32 %v3487_v46, %v3563_v32 }
 0x1de   : > { %v1537_v3 = vshrl.u32 %v1533_v36, 16  ;;  %v1547_v63 = vadd.s32 %v1545_v6, %v1543_v18  ;;  %vm1645_vm9 = vcmp.gt.s32.totalorder %v1644_v59, 0  ;;  %v1434_v60 = vsel %vm3557_vm5, 0, %v3553_v4 }
 0x1df   : > { %v1428_v1 = vmul.f32 %v1427_v11, %v1425_v40  ;;  %vm1566_vm10 = vc.u32 %v1564_v43, %v1560_v20  ;;  %v1646_v7 = vsel %vm1645_vm9, %v1644_v59, 0  ;;  %v1539_v51 = vshrl.u32 %v1534_v39, 16 }
 0x1e0   : > { %v1548_v12 = vadd.s32 %v1547_v63, %v1537_v3  ;;  %v1567_v58 = vsel %vm1566_vm10, 1, %v2432_v0  ;;  %v1648_v54 = vand.u32 31, %v1646_v7  ;;  %v1559_v53 = vshrl.u32 %v1555_v16, 16 }
 0x1e1   : > { %v1429_v49 = vxor.u32 2147483648, %v1428_v1  ;;  %v1569_v33 = vadd.s32 %v1567_v58, %v1565_v31  ;;  %v1561_v52 = vshrl.u32 %v1556_v55, 16  ;;  %v1642_v36 = vor.u32 8388608, %v3548_v28 }
 0x1e2   : > { %v3578_v13 = vadd.s32 %v1548_v12, %v1539_v51  ;;  %v3581_v38 = vsub.s32 32, %v1648_v54  ;;  %v3585_v39 = vadd.s32 %v1564_v43, %v1560_v20  ;;  %v3587_v26 = vshrl.u32 %v1646_v7, 5 }
 0x1e3   : > { %v1430_v4 = vsel %vm1309_vm15, %v1429_v49, %v1428_v1  ;;  %v1570_v59 = vadd.s32 %v1569_v33, %v1559_v53  ;;  %v1651_v46 = vshll.u32 %v2433_v35, %v1648_v54  ;;  %v1654_v32 = vshll.u32 %v2434_v37, %v1648_v54 }
 0x1e4   : > { %v1433_v16 = vsel %vm3557_vm5, %v3296_v17, %v1430_v4  ;;  %v1660_v28 = vshll.u32 %v2436_v44, %v1648_v54  ;;  %v1652_v25 = vshrl.u32 %v2434_v37, %v3581_v38  ;;  %v1655_v10 = vshrl.u32 %v2435_v41, %v3581_v38 }
 0x1e5   : > { %v1435_v14 = vmul.f32 %v1433_v16, %v1433_v16  ;;  %v1571_v55 = vadd.s32 %v1570_v59, %v1561_v52  ;;  %vm1574_vm11 = vc.u32 %v3578_v13, %v3585_v39  ;;  %v1658_v34 = vshrl.u32 %v2436_v44, %v3581_v38 }
 0x1e6   : > { %v1661_v19 = vshrl.u32 %v2437_v47, %v3581_v38  ;;  %v1664_v8 = vshrl.u32 %v2438_v50, %v3581_v38  ;;  %v1657_v5 = vshll.u32 %v2435_v41, %v1648_v54  ;;  %v3608_v24 = vor.u32 %v1652_v25, %v1651_v46 }
 0x1e7   : > { %v1436_v2 = vmul.f32 -0.001358992, %v1435_v14  ;;  %v1443_v21 = vmul.f32 -0.00019511016, %v1435_v14  ;;  %v1575_v62 = vadd.s32 1, %v1571_v55  ;;  %v3610_v30 = vor.u32 %v1655_v10, %v1654_v32 }
 0x1e8   : > { %v1662_v22 = vor.u32 %v1661_v19, %v1660_v28  ;;  %v1663_v23 = vshll.u32 %v2437_v47, %v1648_v54  ;;  %v3613_v20 = vor.u32 %v1658_v34, %v1657_v5  ;;  %v1451_v9 = vadd.s32 3, %v1434_v60 }
 0x1e9   : > { %v1437_v42 = vadd.f32 0.041655596, %v1436_v2  ;;  %v1444_v11 = vadd.f32 0.008332121, %v1443_v21  ;;  %v1576_v27 = vsel %vm1574_vm11, %v1575_v62, %v1571_v55  ;;  %vm1666_vm13 = vcmp.lt.s32.totalorder %v3587_v26, 1 }
 0x1ea   : > { %v1577_v18 = vadd.s32 %v1576_v27, %v1572_v56  ;;  %v1665_v40 = vor.u32 %v1664_v8, %v1663_v23  ;;  %vm1669_vm14 = vcmp.lt.s32.totalorder %v3587_v26, 4  ;;  %vm1668_vm15 = vcmp.lt.s32.totalorder %v3587_v26, 3 }
 0x1eb   : > { %v1438_v6 = vmul.f32 %v1437_v42, %v1435_v14  ;;  %v1445_v57 = vmul.f32 %v1444_v11, %v1435_v14  ;;  %v1674_v3 = vsel %vm1666_vm13, %v3608_v24, %v3610_v30  ;;  %v1675_v63 = vsel %vm1669_vm14, %v1662_v22, 920167782 }
 0x1ec   : > { %v1578_v43 = vadd.s32 536870912, %v1577_v18  ;;  %v1676_v60 = vsel %vm1668_vm15, %v3613_v20, %v1675_v63  ;;  %v3627_v7 = vshll.u32 %v1642_v36, 8  ;;  %vm1667_vm0 = vcmp.lt.s32.totalorder %v3587_v26, 2 }
 0x1ed   : > { %v1439_v31 = vadd.f32 -0.4999988, %v1438_v6  ;;  %v1446_v1 = vadd.f32 -0.16666654, %v1445_v57  ;;  %v1678_v12 = vsel %vm1666_vm13, %v3610_v30, %v3613_v20  ;;  %v1679_v58 = vsel %vm1669_vm14, %v1665_v40, 1326507024 }
 0x1ee   : > { %v3629_v51 = vshrl.u32 %v1578_v43, 30  ;;  %v1677_v53 = vsel %vm1667_vm0, %v1674_v3, %v1676_v60  ;;  %v1680_v33 = vsel %vm1668_vm15, %v1662_v22, %v1679_v58  ;;  %v1452_v56 = vand.u32 3, %v1451_v9 }
 0x1ef   : > { %v1440_v54 = vmul.f32 %v1439_v31, %v1435_v14  ;;  %v1447_v49 = vmul.f32 %v1446_v1, %v1435_v14  ;;  %v1681_v36 = vsel %vm1667_vm0, %v1678_v12, %v1680_v33  ;;  %v1683_v55 = vand.u32 65535, %v3627_v7 }
 0x1f0   : > { %v1580_v52 = vshll.u32 %v3629_v51, 30  ;;  %v1685_v46 = vand.u32 65535, %v1681_v36  ;;  %v1686_v32 = vshrl.u32 %v1681_v36, 16  ;;  %v1708_v14 = vshrl.u32 %v1677_v53, 16 }
 0x1f1   : > { %v1441_v4 = vadd.f32 1.0, %v1440_v54  ;;  %v1448_v59 = vadd.f32 1.0, %v1447_v49  ;;  %vm1450_vm1 = vweird.f32 %v3296_v17  ;;  %v1684_v34 = vshrl.u32 %v3627_v7, 16 }
 0x1f2   : > { %v1581_v28 = vsub.s32 %v1577_v18, %v1580_v52  ;;  %vm1453_vm2 = vcmp.lt.s32.totalorder %v1452_v56, 2  ;;  %v1688_v8 = vmul.u32 %v1686_v32, %v1683_v55  ;;  %vm1454_vm4 = vcmp.eq.s32.totalorder %v1452_v56, 0 }
 0x1f3   : > { %v1449_v25 = vmul.f32 %v1448_v59, %v1433_v16  ;;  %v1458_v10 = vxor.u32 2147483648, %v1441_v4  ;;  %vm1457_vm5 = vcmp.eq.s32.totalorder %v1452_v56, 2  ;;  %v1689_v21 = vmul.u32 %v1685_v46, %v1684_v34 }
 0x1f4   : > { %vm1582_vm3 = vcmp.lt.s32.totalorder %v1581_v28, 0  ;;  %v1583_v19 = vsub.s32 0, %v1581_v28  ;;  %v1691_v5 = vshll.u32 %v1688_v8, 16  ;;  %v1707_v22 = vand.u32 65535, %v1677_v53 }
 0x1f5   : > { %v1455_v2 = vxor.u32 2147483648, %v1449_v25  ;;  %v1710_v23 = vmul.u32 %v1708_v14, %v1683_v55  ;;  %v1459_v16 = vsel %vm1457_vm5, %v1458_v10, %v1449_v25  ;;  %v1687_v27 = vmul.u32 %v1685_v46, %v1683_v55 }
 0x1f6   : > { %v1584_v62 = vsel %vm1582_vm3, %v1583_v19, %v1581_v28  ;;  %v1573_v18 = vadd.s32 %v3585_v39, %v3578_v13  ;;  %v1690_v40 = vmul.u32 %v1686_v32, %v1684_v34  ;;  %v1693_v6 = vshll.u32 %v1689_v21, 16 }
 0x1f7   : > { %v1456_v42 = vsel %vm1454_vm4, %v1441_v4, %v1455_v2  ;;  %v1585_v11 = vclz %v1584_v62  ;;  %vm1695_vm7 = vc.u32 %v1687_v27, %v1691_v5  ;;  %v1697_v3 = vadd.s32 %v1691_v5, %v1687_v27 }
 0x1f8   : > { %v1460_v9 = vsel %vm1453_vm2, %v1456_v42, %v1459_v16  ;;  %v1650_v63 = vshrl.u32 %v2433_v35, %v3581_v38  ;;  %v1696_v31 = vsel %vm1695_vm7, 1, %v2432_v0  ;;  %v1711_v1 = vmul.u32 %v1707_v22, %v1684_v34 }
 0x1f9   : > { %v1461_v57 = vsel %vm1450_vm1, nan, %v1460_v9  ;;  %v2254_v43 = vadd.s32 4294967294, %v1585_v11  ;;  %v1713_v60 = vshll.u32 %v1710_v23, 16  ;;  %v1671_v13 = vsel %vm1669_vm14, %v3613_v20, 2102212464 }
 0x1fa   : > { %1463 = vst [vmem:[%s2878_s29 + $0x38] sm:$0x3f] %v1461_v57  ;;  %v1698_v39 = vadd.s32 %v1696_v31, %v1690_v40  ;;  %vm1699_vm8 = vc.u32 %v1697_v3, %v1693_v6  ;;  %v1692_v12 = vshrl.u32 %v1688_v8, 16  ;;  %v1709_v54 = vmul.u32 %v1707_v22, %v1683_v55 }
 0x1fb   : > { %vm2255_vm6 = vcmp.lt.s32.totalorder %v2254_v43, 0  ;;  %v1700_v58 = vsel %vm1699_vm8, 1, %v2432_v0  ;;  %v1712_v38 = vmul.u32 %v1708_v14, %v1684_v34  ;;  %v1715_v52 = vshll.u32 %v1711_v1, 16 }
 0x1fc   : > { %v1588_v17 = vsel %vm2255_vm6, 0, %v2254_v43  ;;  %v1702_v33 = vadd.s32 %v1700_v58, %v1698_v39  ;;  %vm1717_vm9 = vc.u32 %v1709_v54, %v1713_v60  ;;  %v1719_v36 = vadd.s32 %v1713_v60, %v1709_v54 }
 0x1fd   : > { %v1589_v49 = vsub.s32 32, %v1588_v17  ;;  %v1593_v53 = vsub.s32 4294967266, %v1588_v17  ;;  %v1590_v56 = vshll.u32 %v1581_v28, %v1588_v17  ;;  %v1718_v20 = vsel %vm1717_vm9, 1, %v2432_v0 }
 0x1fe   : > { %v1703_v46 = vadd.s32 %v1702_v33, %v1692_v12  ;;  %v1670_v32 = vsel %vm1666_vm13, %v1650_v63, %v3608_v24  ;;  %v1720_v25 = vadd.s32 %v1718_v20, %v1712_v38  ;;  %vm1721_vm10 = vc.u32 %v1719_v36, %v1715_v52 }
 0x1ff   : > { %v1591_v4 = vshrl.u32 %v1573_v18, %v1589_v49  ;;  %v1594_v59 = vadd.s32 127, %v1593_v53  ;;  %v3666_v55 = vadd.f32 1.5707964, %v3356_v29  ;;  %v1694_v28 = vshrl.u32 %v1689_v21, 16 }
 0x200   : > { %v1722_v34 = vsel %vm1721_vm10, 1, %v2432_v0  ;;  %v1672_v19 = vsel %vm1668_vm15, %v3610_v30, %v1671_v13  ;;  %v1714_v8 = vshrl.u32 %v1710_v23, 16  ;;  %v1603_v24 = vsub.s32 4, %v3629_v51 }
 0x201   : > { %v1592_v10 = vor.u32 %v1591_v4, %v1590_v56  ;;  %v1595_v14 = vshll.u32 %v1594_v59, 23  ;;  %v1724_v2 = vadd.s32 %v1722_v34, %v1720_v25  ;;  %v1801_v62 = vand.u32 2147483647, %v3666_v55 }
 0x202   : > { %v1704_v22 = vadd.s32 %v1703_v46, %v1694_v28  ;;  %v3675_v42 = vadd.f32 1.5707964, %v3481_v61  ;;  %v1716_v16 = vshrl.u32 %v1711_v1, 16  ;;  %v1804_v21 = vand.u32 2139095040, %v3666_v55 }
 0x203   : > { %v1596_v5 = vor.u32 4788187, %v1595_v14  ;;  %v1725_v11 = vadd.s32 %v1724_v2, %v1714_v8  ;;  %vm1481_vm11 = vcmp.lt.s32.totalorder %v3356_v29, 0  ;;  %v1599_v9 = vcvt.s32.f32 %v1592_v10 }
 0x204   : > { %v1723_v30 = vadd.s32 %v1719_v36, %v1715_v52  ;;  %v1673_v23 = vsel %vm1667_vm0, %v1670_v32, %v1672_v19  ;;  %v1805_v40 = vshrl.u32 %v1804_v21, 23  ;;  %v1808_v6 = vand.u32 8388607, %v1801_v62 }
 0x205   : > { %v1597_v27 = vand.u32 2147483647, %v1596_v5  ;;  %v1726_v18 = vadd.s32 %v1725_v11, %v1716_v16  ;;  %v1604_v43 = vsel %vm1481_vm11, %v1603_v24, %v3629_v51  ;;  %v1959_v3 = vand.u32 2139095040, %v3675_v42 }
 0x206   : > { %vm1729_vm13 = vc.u32 %v1704_v22, %v1723_v30  ;;  %v2259_v31 = vadd.s32 4294967169, %v1805_v40  ;;  %vm1480_vm14 = vcmp.le.f32.partialorder %v1479_v48, 0.7853982  ;;  %v1727_v1 = vmul.u32 %v3627_v7, %v1673_v23 }
 0x207   : > { %v1600_v57 = vmul.f32 %v1599_v9, %v1597_v27  ;;  %v1730_v63 = vadd.s32 1, %v1726_v18  ;;  %v1606_v60 = vsel %vm1480_vm14, 0, %v1604_v43  ;;  %v1809_v39 = vor.u32 8388608, %v1808_v6 }
 0x208   : > { %v1811_v17 = vadd.s32 1, %v2259_v31  ;;  %v1960_v51 = vshrl.u32 %v1959_v3, 23  ;;  %v1623_v53 = vadd.s32 3, %v1606_v60  ;;  %v1956_v7 = vand.u32 2147483647, %v3675_v42 }
 0x209   : > { %v1601_v26 = vxor.u32 2147483648, %v1600_v57  ;;  %v1731_v13 = vsel %vm1729_vm13, %v1730_v63, %v1726_v18  ;;  %v3693_v56 = vshll.u32 %v1809_v39, 8  ;;  %vm1636_vm0 = vcmp.lt.s32.totalorder %v3481_v61, 0 }
 0x20a   : > { %v1732_v58 = vadd.s32 %v1731_v13, %v1727_v1  ;;  %vm1812_vm15 = vcmp.gt.s32.totalorder %v1811_v17, 0  ;;  %v2262_v59 = vadd.s32 4294967169, %v1960_v51  ;;  %v3696_v25 = vand.u32 3, %v1623_v53 }
 0x20b   : > { %v1602_v12 = vsel %vm1481_vm11, %v1601_v26, %v1600_v57  ;;  %v1813_v38 = vsel %vm1812_vm15, %v1811_v17, 0  ;;  %v3699_v14 = vadd.s32 %v1723_v30, %v1704_v22  ;;  %v3702_v28 = vand.u32 65535, %v3693_v56 }
 0x20c   : > { %v1605_v54 = vsel %vm1480_vm14, %v3356_v29, %v1602_v12  ;;  %v1733_v33 = vadd.s32 536870912, %v1732_v58  ;;  %v1815_v48 = vand.u32 31, %v1813_v38  ;;  %v3705_v34 = vshrl.u32 %v3693_v56, 16 }
 0x20d   : > { %v1607_v49 = vmul.f32 %v1605_v54, %v1605_v54  ;;  %v3709_v19 = vand.u32 8388607, %v1956_v7  ;;  %v3713_v24 = vadd.s32 1, %v2262_v59  ;;  %v3715_v16 = vshrl.u32 %v1813_v38, 5 }
 0x20e   : > { %v1734_v4 = vshrl.u32 %v1733_v33, 30  ;;  %v1816_v46 = vsub.s32 32, %v1815_v48  ;;  %v1818_v22 = vshll.u32 %v2433_v35, %v1815_v48  ;;  %vm1629_vm1 = vcmp.eq.s32.totalorder %v3696_v25, 2 }
 0x20f   : > { %v1608_v52 = vmul.f32 -0.001358992, %v1607_v49  ;;  %v1615_v36 = vmul.f32 -0.00019511016, %v1607_v49  ;;  %vm1626_vm3 = vcmp.eq.s32.totalorder %v3696_v25, 0  ;;  %v1821_v18 = vshll.u32 %v2434_v37, %v1815_v48 }
 0x210   : > { %v1735_v10 = vshll.u32 %v1734_v4, 30  ;;  %v1819_v11 = vshrl.u32 %v2434_v37, %v1816_v46  ;;  %v1822_v21 = vshrl.u32 %v2435_v41, %v1816_v46  ;;  %v1758_v23 = vsub.s32 4, %v1734_v4 }
 0x211   : > { %v1609_v20 = vadd.f32 0.041655596, %v1608_v52  ;;  %v1616_v32 = vadd.f32 0.008332121, %v1615_v36  ;;  %v1825_v40 = vshrl.u32 %v2436_v44, %v1816_v46  ;;  %v1828_v6 = vshrl.u32 %v2437_v47, %v1816_v46 }
 0x212   : > { %v3711_v5 = vsub.s32 %v1732_v58, %v1735_v10  ;;  %vm1625_vm4 = vcmp.lt.s32.totalorder %v3696_v25, 2  ;;  %v1831_v63 = vshrl.u32 %v2438_v50, %v1816_v46  ;;  %vm1622_vm5 = vweird.f32 %v3356_v29 }
 0x213   : > { %v1610_v8 = vmul.f32 %v1609_v20, %v1607_v49  ;;  %v1617_v2 = vmul.f32 %v1616_v32, %v1607_v49  ;;  %v1820_v26 = vor.u32 %v1819_v11, %v1818_v22  ;;  %v1823_v1 = vor.u32 %v1822_v21, %v1821_v18 }
 0x214   : > { %vm1737_vm2 = vcmp.lt.s32.totalorder %v3711_v5, 0  ;;  %v1738_v30 = vsub.s32 0, %v3711_v5  ;;  %v1824_v60 = vshll.u32 %v2435_v41, %v1815_v48  ;;  %v1827_v17 = vshll.u32 %v2436_v44, %v1815_v48 }
 0x215   : > { %v1611_v27 = vadd.f32 -0.4999988, %v1610_v8  ;;  %v1618_v9 = vadd.f32 -0.16666654, %v1617_v2  ;;  %v1830_v12 = vshll.u32 %v2437_v47, %v1815_v48  ;;  %v3736_v51 = vsel %vm1636_vm0, %v1758_v23, %v1734_v4 }
 0x216   : > { %v1739_v3 = vsel %vm1737_vm2, %v1738_v30, %v3711_v5  ;;  %v1826_v53 = vor.u32 %v1825_v40, %v1824_v60  ;;  %v1829_v52 = vor.u32 %v1828_v6, %v1827_v17  ;;  %vm3741_vm7 = vcmp.le.f32.partialorder %v1634_v45, 0.7853982 }
 0x217   : > { %v1612_v57 = vmul.f32 %v1611_v27, %v1607_v49  ;;  %v1619_v43 = vmul.f32 %v1618_v9, %v1607_v49  ;;  %v1740_v31 = vclz %v1739_v3  ;;  %v1817_v49 = vshrl.u32 %v2433_v35, %v1816_v46 }
 0x218   : > { %v1832_v36 = vor.u32 %v1831_v63, %v1830_v12  ;;  %vm1833_vm8 = vcmp.lt.s32.totalorder %v3715_v16, 1  ;;  %vm1834_vm9 = vcmp.lt.s32.totalorder %v3715_v16, 2  ;;  %vm1835_vm10 = vcmp.lt.s32.totalorder %v3715_v16, 3 }
 0x219   : > { %v1613_v13 = vadd.f32 1.0, %v1612_v57  ;;  %v1620_v39 = vadd.f32 1.0, %v1619_v43  ;;  %v2257_v58 = vadd.s32 4294967294, %v1740_v31  ;;  %vm1836_vm11 = vcmp.lt.s32.totalorder %v3715_v16, 4 }
 0x21a   : > { %v1842_v8 = vsel %vm1836_vm11, %v1829_v52, 920167782  ;;  %v1845_v2 = vsel %vm1833_vm8, %v1823_v1, %v1826_v53  ;;  %v1846_v22 = vsel %vm1836_vm11, %v1832_v36, 1326507024  ;;  %v1838_v30 = vsel %vm1836_vm11, %v1826_v53, 2102212464 }
 0x21b   : > { %v1621_v33 = vmul.f32 %v1620_v39, %v1605_v54  ;;  %v1630_v38 = vxor.u32 2147483648, %v1613_v13  ;;  %vm2258_vm6 = vcmp.lt.s32.totalorder %v2257_v58, 0  ;;  %v1841_v54 = vsel %vm1833_vm8, %v1820_v26, %v1823_v1 }
 0x21c   : > { %v1743_v4 = vsel %vm2258_vm6, 0, %v2257_v58  ;;  %v1843_v9 = vsel %vm1835_vm10, %v1826_v53, %v1842_v8  ;;  %v1847_v18 = vsel %vm1835_vm10, %v1829_v52, %v1846_v22  ;;  %v1837_v31 = vsel %vm1833_vm8, %v1817_v49, %v1820_v26 }
 0x21d   : > { %v1627_v48 = vxor.u32 2147483648, %v1621_v33  ;;  %v1631_v45 = vsel %vm1629_vm1, %v1630_v38, %v1621_v33  ;;  %v1744_v46 = vsub.s32 32, %v1743_v4  ;;  %v1745_v20 = vshll.u32 %v3711_v5, %v1743_v4 }
 0x21e   : > { %v1748_v32 = vsub.s32 4294967266, %v1743_v4  ;;  %v1844_v23 = vsel %vm1834_vm9, %v1841_v54, %v1843_v9  ;;  %v1839_v60 = vsel %vm1835_vm10, %v1823_v1, %v1838_v30  ;;  %v1761_v39 = vsel %vm3741_vm7, 0, %v3736_v51 }
 0x21f   : > { %v1628_v10 = vsel %vm1626_vm3, %v1613_v13, %v1627_v48  ;;  %v1746_v21 = vshrl.u32 %v3699_v14, %v1744_v46  ;;  %v1848_v14 = vsel %vm1834_vm9, %v1845_v2, %v1847_v18  ;;  %v1874_v3 = vand.u32 65535, %v1844_v23 }
 0x220   : > { %v1632_v11 = vsel %vm1625_vm4, %v1628_v10, %v1631_v45  ;;  %v1749_v27 = vadd.s32 127, %v1748_v32  ;;  %v1852_v57 = vand.u32 65535, %v1848_v14  ;;  %v1853_v43 = vshrl.u32 %v1848_v14, 16 }
 0x221   : > { %v1633_v5 = vsel %vm1622_vm5, nan, %v1632_v11  ;;  %v1747_v25 = vor.u32 %v1746_v21, %v1745_v20  ;;  %v1875_v63 = vshrl.u32 %v1844_v23, 16  ;;  %v1964_v13 = vor.u32 8388608, %v3709_v19 }
 0x222   : > { %v1750_v40 = vshll.u32 %v1749_v27, 23  ;;  %v1791_v6 = vrot.slane %v1633_v5, 4  ;;  %v1855_v17 = vmul.u32 %v1853_v43, %v3702_v28  ;;  %v1856_v12 = vmul.u32 %v1852_v57, %v3705_v34 }
 0x223   : > { %vm1967_vm13 = vcmp.gt.s32.totalorder %v3713_v24, 0  ;;  %v1754_v53 = vcvt.s32.f32 %v1747_v25  ;;  %v1877_v26 = vmul.u32 %v1875_v63, %v3702_v28  ;;  %v1878_v49 = vmul.u32 %v1874_v3, %v3705_v34 }
 0x224   : > { %v1751_v29 = vor.u32 4788187, %v1750_v40  ;;  %1795 = vst [vmem:[%s2878_s29 + $0x10] sm:$0xf0] %v1791_v6  ;;  %v3788_v1 = vsel %vm1834_vm9, %v1837_v31, %v1839_v60  ;;  %v1854_v33 = vmul.u32 %v1852_v57, %v3702_v28  ;;  %v1857_v51 = vmul.u32 %v1853_v43, %v3705_v34 }
 0x225   : > { %1797 = vst [vmem:[%s2878_s29 + $0x20] sm:$0x3] %v1791_v6  ;;  %v1858_v38 = vshll.u32 %v1855_v17, 16  ;;  %v1860_v36 = vshll.u32 %v1856_v12, 16  ;;  %v1876_v48 = vmul.u32 %v1874_v3, %v3702_v28  ;;  %v1880_v4 = vshll.u32 %v1877_v26, 16 }
 0x226   : > { %v1752_v58 = vand.u32 2147483647, %v1751_v29  ;;  %v1879_v45 = vmul.u32 %v1875_v63, %v3705_v34  ;;  %v1882_v46 = vshll.u32 %v1878_v49, 16  ;;  %v1968_v2 = vsel %vm1967_vm13, %v3713_v24, 0 }
 0x227   : > { %vm1862_vm14 = vc.u32 %v1854_v33, %v1858_v38  ;;  %v1864_v54 = vadd.s32 %v1858_v38, %v1854_v33  ;;  %vm1884_vm15 = vc.u32 %v1876_v48, %v1880_v4  ;;  %v1886_v32 = vadd.s32 %v1880_v4, %v1876_v48 }
 0x228   : > { %v1755_v52 = vmul.f32 %v1754_v53, %v1752_v58  ;;  %v1863_v16 = vsel %vm1862_vm14, 1, %v2432_v0  ;;  %v1885_v8 = vsel %vm1884_vm15, 1, %v2432_v0  ;;  %v1859_v21 = vshrl.u32 %v1855_v17, 16 }
 0x229   : > { %v1865_v10 = vadd.s32 %v1863_v16, %v1857_v51  ;;  %vm1866_vm1 = vc.u32 %v1864_v54, %v1860_v36  ;;  %v1887_v34 = vadd.s32 %v1885_v8, %v1879_v45  ;;  %vm1888_vm2 = vc.u32 %v1886_v32, %v1882_v46 }
 0x22a   : > { %v1756_v20 = vxor.u32 2147483648, %v1755_v52  ;;  %v1867_v22 = vsel %vm1866_vm1, 1, %v2432_v0  ;;  %v1889_v9 = vsel %vm1888_vm2, 1, %v2432_v0  ;;  %v1881_v30 = vshrl.u32 %v1877_v26, 16 }
 0x22b   : > { %v1869_v27 = vadd.s32 %v1867_v22, %v1865_v10  ;;  %v1891_v23 = vadd.s32 %v1889_v9, %v1887_v34  ;;  %v1970_v18 = vand.u32 31, %v1968_v2  ;;  %v1778_v24 = vadd.s32 3, %v1761_v39 }
 0x22c   : > { %v1757_v28 = vsel %vm1636_vm0, %v1756_v20, %v1755_v52  ;;  %v1861_v25 = vshrl.u32 %v1856_v12, 16  ;;  %v1883_v6 = vshrl.u32 %v1878_v49, 16  ;;  %v3810_v59 = vadd.s32 %v1886_v32, %v1882_v46 }
 0x22d   : > { %v1760_v11 = vsel %vm3741_vm7, %v3481_v61, %v1757_v28  ;;  %v1870_v40 = vadd.s32 %v1869_v27, %v1859_v21  ;;  %v1892_v43 = vadd.s32 %v1891_v23, %v1881_v30  ;;  %v3806_v3 = vsub.s32 32, %v1970_v18 }
 0x22e   : > { %v1762_v5 = vmul.f32 %v1760_v11, %v1760_v11  ;;  %v1894_v29 = vmul.u32 %v3693_v56, %v3788_v1  ;;  %v3814_v31 = vshrl.u32 %v1968_v2, 5  ;;  %v1973_v12 = vshll.u32 %v2433_v35, %v1970_v18 }
 0x22f   : > { %v3808_v63 = vadd.s32 %v1870_v40, %v1861_v25  ;;  %v1893_v39 = vadd.s32 %v1892_v43, %v1883_v6  ;;  %v1976_v58 = vshll.u32 %v2434_v37, %v1970_v18  ;;  %v1977_v53 = vshrl.u32 %v2435_v41, %v3806_v3 }
 0x230   : > { %v1763_v14 = vmul.f32 -0.001358992, %v1762_v5  ;;  %v1770_v57 = vmul.f32 -0.00019511016, %v1762_v5  ;;  %v1979_v26 = vshll.u32 %v2435_v41, %v1970_v18  ;;  %v1980_v1 = vshrl.u32 %v2436_v44, %v3806_v3 }
 0x231   : > { %vm1896_vm0 = vc.u32 %v3808_v63, %v3810_v59  ;;  %v1897_v56 = vadd.s32 1, %v1893_v39  ;;  %v1974_v51 = vshrl.u32 %v2434_v37, %v3806_v3  ;;  %v3827_v38 = vor.u32 %v1977_v53, %v1976_v58 }
 0x232   : > { %v1764_v60 = vadd.f32 0.041655596, %v1763_v14  ;;  %v1771_v17 = vadd.f32 0.008332121, %v1770_v57  ;;  %v1982_v52 = vshll.u32 %v2436_v44, %v1970_v18  ;;  %v1983_v36 = vshrl.u32 %v2437_v47, %v3806_v3 }
 0x233   : > { %v1898_v54 = vsel %vm1896_vm0, %v1897_v56, %v1893_v39  ;;  %v3832_v41 = vor.u32 %v1980_v1, %v1979_v26  ;;  %v1985_v20 = vshll.u32 %v2437_v47, %v1970_v18  ;;  %v1986_v16 = vshrl.u32 %v2438_v50, %v3806_v3 }
 0x234   : > { %v1765_v49 = vmul.f32 %v1764_v60, %v1762_v5  ;;  %v1772_v33 = vmul.f32 %v1771_v17, %v1762_v5  ;;  %v1899_v45 = vadd.s32 %v1898_v54, %v1894_v29  ;;  %v1984_v46 = vor.u32 %v1983_v36, %v1982_v52 }
 0x235   : > { %v1779_v10 = vand.u32 3, %v1778_v24  ;;  %v3839_v44 = vshll.u32 %v1964_v13, 8  ;;  %vm1777_vm3 = vweird.f32 %v3481_v61  ;;  %v3842_v2 = vor.u32 %v1974_v51, %v1973_v12 }
 0x236   : > { %v1766_v48 = vadd.f32 -0.4999988, %v1765_v49  ;;  %v1773_v4 = vadd.f32 -0.16666654, %v1772_v33  ;;  %v1900_v8 = vadd.s32 536870912, %v1899_v45  ;;  %v1987_v28 = vor.u32 %v1986_v16, %v1985_v20 }
 0x237   : > { %vm1991_vm4 = vcmp.lt.s32.totalorder %v3814_v31, 4  ;;  %vm1988_vm5 = vcmp.lt.s32.totalorder %v3814_v31, 1  ;;  %vm1990_vm7 = vcmp.lt.s32.totalorder %v3814_v31, 3  ;;  %vm1989_vm6 = vcmp.lt.s32.totalorder %v3814_v31, 2 }
 0x238   : > { %v1767_v37 = vmul.f32 %v1766_v48, %v1762_v5  ;;  %v1774_v32 = vmul.f32 %v1773_v4, %v1762_v5  ;;  %v1997_v50 = vsel %vm1991_vm4, %v1984_v46, 920167782  ;;  %v3848_v34 = vshrl.u32 %v1900_v8, 30 }
 0x239   : > { %v2000_v19 = vsel %vm1988_vm5, %v3827_v38, %v3832_v41  ;;  %v2001_v13 = vsel %vm1991_vm4, %v1987_v28, 1326507024  ;;  %v1996_v30 = vsel %vm1988_vm5, %v3842_v2, %v3827_v38  ;;  %v1998_v23 = vsel %vm1990_vm7, %v3832_v41, %v1997_v50 }
 0x23a   : > { %v1768_v22 = vadd.f32 1.0, %v1767_v37  ;;  %v1775_v47 = vadd.f32 1.0, %v1774_v32  ;;  %v2002_v9 = vsel %vm1990_vm7, %v1984_v46, %v2001_v13  ;;  %v1902_v5 = vshll.u32 %v3848_v34, 30 }
 0x23b   : > { %vm1780_vm8 = vcmp.lt.s32.totalorder %v1779_v10, 2  ;;  %vm1781_vm9 = vcmp.eq.s32.totalorder %v1779_v10, 0  ;;  %vm1784_vm10 = vcmp.eq.s32.totalorder %v1779_v10, 2  ;;  %v2006_v40 = vshrl.u32 %v3839_v44, 16 }
 0x23c   : > { %v1776_v21 = vmul.f32 %v1775_v47, %v1760_v11  ;;  %v1785_v27 = vxor.u32 2147483648, %v1768_v22  ;;  %v2003_v11 = vsel %vm1989_vm6, %v2000_v19, %v2002_v9  ;;  %v1903_v25 = vsub.s32 %v1899_v45, %v1902_v5 }
 0x23d   : > { %v2007_v24 = vand.u32 65535, %v2003_v11  ;;  %v2008_v6 = vshrl.u32 %v2003_v11, 16  ;;  %v1999_v43 = vsel %vm1989_vm6, %v1996_v30, %v1998_v23  ;;  %v2005_v29 = vand.u32 65535, %v3839_v44 }
 0x23e   : > { %v1782_v18 = vxor.u32 2147483648, %v1776_v21  ;;  %v1786_v57 = vsel %vm1784_vm10, %v1785_v27, %v1776_v21  ;;  %vm1904_vm11 = vcmp.lt.s32.totalorder %v1903_v25, 0  ;;  %v1905_v17 = vsub.s32 0, %v1903_v25 }
 0x23f   : > { %v2011_v39 = vmul.u32 %v2007_v24, %v2006_v40  ;;  %v2010_v58 = vmul.u32 %v2008_v6, %v2005_v29  ;;  %v2029_v49 = vand.u32 65535, %v1999_v43  ;;  %v2009_v56 = vmul.u32 %v2007_v24, %v2005_v29 }
 0x240   : > { %v1783_v14 = vsel %vm1781_vm9, %v1768_v22, %v1782_v18  ;;  %v1906_v26 = vsel %vm1904_vm11, %v1905_v17, %v1903_v25  ;;  %v2030_v51 = vshrl.u32 %v1999_v43, 16  ;;  %v2012_v52 = vmul.u32 %v2008_v6, %v2006_v40 }
 0x241   : > { %v1787_v60 = vsel %vm1780_vm8, %v1783_v14, %v1786_v57  ;;  %v1907_v33 = vclz %v1906_v26  ;;  %v2013_v1 = vshll.u32 %v2010_v58, 16  ;;  %v2015_v36 = vshll.u32 %v2011_v39, 16 }
 0x242   : > { %v1788_v12 = vsel %vm1777_vm3, nan, %v1787_v60  ;;  %v2032_v54 = vmul.u32 %v2030_v51, %v2005_v29  ;;  %v1895_v61 = vadd.s32 %v3810_v59, %v3808_v63  ;;  %v2033_v46 = vmul.u32 %v2029_v49, %v2006_v40 }
 0x243   : > { %v1792_v53 = vrot.slane %v1788_v12, 4  ;;  %v2260_v48 = vadd.s32 4294967294, %v1907_v33  ;;  %vm2017_vm13 = vc.u32 %v2009_v56, %v2013_v1  ;;  %v2019_v4 = vadd.s32 %v2013_v1, %v2009_v56 }
 0x244   : > { %v2018_v45 = vsel %vm2017_vm13, 1, %v2432_v0  ;;  %v2035_v16 = vshll.u32 %v2032_v54, 16  ;;  %v2014_v32 = vshrl.u32 %v2010_v58, 16  ;;  %v2031_v8 = vmul.u32 %v2029_v49, %v2005_v29 }
 0x245   : > { %1796 = vst [vmem:[%s2878_s29 + $0x18] sm:$0xf0] %v1792_v53  ;;  %vm2261_vm14 = vcmp.lt.s32.totalorder %v2260_v48, 0  ;;  %v2020_v20 = vadd.s32 %v2018_v45, %v2012_v52  ;;  %vm2021_vm15 = vc.u32 %v2019_v4, %v2015_v36  ;;  %v2034_v50 = vmul.u32 %v2030_v51, %v2006_v40 }
 0x246   : > { %1798 = vst [vmem:[%s2878_s29 + $0x28] sm:$0x3] %v1792_v53  ;;  %v1910_v37 = vsel %vm2261_vm14, 0, %v2260_v48  ;;  %v2022_v10 = vsel %vm2021_vm15, 1, %v2432_v0  ;;  %v2037_v13 = vshll.u32 %v2033_v46, 16  ;;  %vm2039_vm1 = vc.u32 %v2031_v8, %v2035_v16 }
 0x247   : > { %v1911_v28 = vsub.s32 32, %v1910_v37  ;;  %v1915_v22 = vsub.s32 4294967266, %v1910_v37  ;;  %v2024_v47 = vadd.s32 %v2022_v10, %v2020_v20  ;;  %v1912_v19 = vshll.u32 %v1903_v25, %v1910_v37 }
 0x248   : > { %v2041_v63 = vadd.s32 %v2035_v16, %v2031_v8  ;;  %v2040_v9 = vsel %vm2039_vm1, 1, %v2432_v0  ;;  %v1972_v5 = vshrl.u32 %v2433_v35, %v3806_v3  ;;  %v1993_v30 = vsel %vm1991_vm4, %v3832_v41, 2102212464 }
 0x249   : > { %v1913_v59 = vshrl.u32 %v1895_v61, %v1911_v28  ;;  %v1916_v21 = vadd.s32 127, %v1915_v22  ;;  %v2025_v27 = vadd.s32 %v2024_v47, %v2014_v32  ;;  %v2042_v23 = vadd.s32 %v2040_v9, %v2034_v50 }
 0x24a   : > { %vm2043_vm2 = vc.u32 %v2041_v63, %v2037_v13  ;;  %v2016_v24 = vshrl.u32 %v2011_v39, 16  ;;  %v2036_v40 = vshrl.u32 %v2032_v54, 16  ;;  %v1992_v57 = vsel %vm1988_vm5, %v1972_v5, %v3842_v2 }
 0x24b   : > { %v1914_v11 = vor.u32 %v1913_v59, %v1912_v19  ;;  %v1917_v18 = vshll.u32 %v1916_v21, 23  ;;  %v2044_v25 = vsel %vm2043_vm2, 1, %v2432_v0  ;;  %v1994_v35 = vsel %vm1990_vm7, %v3827_v38, %v1993_v30 }
 0x24c   : > { %v2046_v6 = vadd.s32 %v2044_v25, %v2042_v23  ;;  %v2026_v3 = vadd.s32 %v2025_v27, %v2016_v24  ;;  %v2038_v41 = vshrl.u32 %v2033_v46, 16  ;;  %v2045_v17 = vadd.s32 %v2041_v63, %v2037_v13 }
 0x24d   : > { %v1918_v14 = vor.u32 4788187, %v1917_v18  ;;  %v1921_v60 = vcvt.s32.f32 %v1914_v11  ;;  %v1995_v0 = vsel %vm1989_vm6, %v1992_v57, %v1994_v35  ;;  %vm1803_vm3 = vcmp.lt.s32.totalorder %v3666_v55, 0 }
 0x24e   : > { %v2047_v43 = vadd.s32 %v2046_v6, %v2036_v40  ;;  %vm2051_vm0 = vc.u32 %v2026_v3, %v2045_v17  ;;  %v2049_v2 = vmul.u32 %v3839_v44, %v1995_v0  ;;  %v1925_v38 = vsub.s32 4, %v3848_v34 }
 0x24f   : > { %v1919_v29 = vand.u32 2147483647, %v1918_v14  ;;  %vm3902_vm4 = vcmp.le.f32.partialorder %v1801_v62, 0.7853982  ;;  %v2050_v9 = vadd.s32 %v2045_v17, %v2026_v3  ;;  %vm1944_vm9 = vweird.f32 %v3666_v55 }
 0x250   : > { %v2048_v39 = vadd.s32 %v2047_v43, %v2038_v41  ;;  %v1926_v44 = vsel %vm1803_vm3, %v1925_v38, %v3848_v34  ;;  %vm1958_vm11 = vcmp.lt.s32.totalorder %v3675_v42, 0  ;;  %vm1957_vm13 = vcmp.le.f32.partialorder %v1956_v7, 0.7853982 }
 0x251   : > { %v1922_v12 = vmul.f32 %v1921_v60, %v1919_v29  ;;  %v1928_v62 = vsel %vm3902_vm4, 0, %v1926_v44  ;;  %v2333_v29 = vld [vmem:[%s2547_s26 + $0x2] ss:$4 sm:$0x3]  ;;  %vm2099_vm1 = vweird.f32 %v3675_v42 }
 0x252   : > { %v2052_v58 = vadd.s32 1, %v2048_v39  ;;  %v1945_v16 = vadd.s32 3, %v1928_v62 }
 0x253   : > { %v1923_v53 = vxor.u32 2147483648, %v1922_v12 }
 0x254   : > { %v2053_v26 = vsel %vm2051_vm0, %v2052_v58, %v2048_v39  ;;  %v1946_v19 = vand.u32 3, %v1945_v16 }
 0x255   : > { %v1924_v31 = vsel %vm1803_vm3, %v1923_v53, %v1922_v12  ;;  %v2054_v33 = vadd.s32 %v2053_v26, %v2049_v2 }
 0x256   : > { %v1927_v56 = vsel %vm3902_vm4, %v3666_v55, %v1924_v31  ;;  %vm1948_vm6 = vcmp.eq.s32.totalorder %v1946_v19, 0  ;;  %vm1951_vm8 = vcmp.eq.s32.totalorder %v1946_v19, 2  ;;  %vm1947_vm10 = vcmp.lt.s32.totalorder %v1946_v19, 2 }
 0x257   : > { %v1929_v1 = vmul.f32 %v1927_v56, %v1927_v56  ;;  %v2055_v51 = vadd.s32 536870912, %v2054_v33  ;;  %v2265_v55 = vadd.f32 -0.5, %v2333_v29 }
 0x259   : > { %v1930_v52 = vmul.f32 -0.001358992, %v1929_v1  ;;  %v1937_v36 = vmul.f32 -0.00019511016, %v1929_v1  ;;  %v3910_v48 = vshrl.u32 %v2055_v51, 30  ;;  %v2122_v17 = vmul.f32 2.0, %v2265_v55 }
 0x25b   : > { %v1931_v4 = vadd.f32 0.041655596, %v1930_v52  ;;  %v1938_v54 = vadd.f32 0.008332121, %v1937_v36  ;;  %v2057_v61 = vshll.u32 %v3910_v48, 30  ;;  %v2080_v12 = vsub.s32 4, %v3910_v48 }
 0x25c   : > { %2266 = vst.msk [vmem:[%s2878_s29 + $0x46] ss:$8 sm:$0x3] %vm3090_vm12, %v2122_v17 }
 0x25d   : > { %v1932_v45 = vmul.f32 %v1931_v4, %v1929_v1  ;;  %v1939_v46 = vmul.f32 %v1938_v54, %v1929_v1  ;;  %v2058_v20 = vsub.s32 %v2054_v33, %v2057_v61  ;;  %v2081_v26 = vsel %vm1958_vm11, %v2080_v12, %v3910_v48 }
 0x25e   : > { %v2083_v15 = vsel %vm1957_vm13, 0, %v2081_v26 }
 0x25f   : > { %v1933_v37 = vadd.f32 -0.4999988, %v1932_v45  ;;  %v1940_v32 = vadd.f32 -0.16666654, %v1939_v46  ;;  %vm2059_vm5 = vcmp.lt.s32.totalorder %v2058_v20, 0  ;;  %v2060_v10 = vsub.s32 0, %v2058_v20 }
 0x260   : > { %v2100_v7 = vadd.s32 3, %v2083_v15 }
 0x261   : > { %v1934_v34 = vmul.f32 %v1933_v37, %v1929_v1  ;;  %v1941_v8 = vmul.f32 %v1940_v32, %v1929_v1  ;;  %v2061_v28 = vsel %vm2059_vm5, %v2060_v10, %v2058_v20 }
 0x262   : > { %v2062_v22 = vclz %v2061_v28  ;;  %v2101_v4 = vand.u32 3, %v2100_v7 }
 0x263   : > { %v1935_v47 = vadd.f32 1.0, %v1934_v34  ;;  %v1942_v50 = vadd.f32 1.0, %v1941_v8 }
 0x264   : > { %v2263_v13 = vadd.s32 4294967294, %v2062_v22  ;;  %vm2103_vm12 = vcmp.eq.s32.totalorder %v2101_v4, 0  ;;  %vm2106_vm14 = vcmp.eq.s32.totalorder %v2101_v4, 2  ;;  %vm2102_vm15 = vcmp.lt.s32.totalorder %v2101_v4, 2 }
 0x265   : > { %v1943_v63 = vmul.f32 %v1942_v50, %v1927_v56  ;;  %v1952_v59 = vxor.u32 2147483648, %v1935_v47 }
 0x266   : > { %vm2264_vm7 = vcmp.lt.s32.totalorder %v2263_v13, 0 }
 0x267   : > { %v1949_v21 = vxor.u32 2147483648, %v1943_v63  ;;  %v2065_v27 = vsel %vm2264_vm7, 0, %v2263_v13  ;;  %v1953_v11 = vsel %vm1951_vm8, %v1952_v59, %v1943_v63 }
 0x268   : > { %v2066_v5 = vsub.s32 32, %v2065_v27  ;;  %v2070_v30 = vsub.s32 4294967266, %v2065_v27  ;;  %v2067_v24 = vshll.u32 %v2058_v20, %v2065_v27 }
 0x269   : > { %v1950_v23 = vsel %vm1948_vm6, %v1935_v47, %v1949_v21 }
 0x26a   : > { %v1954_v18 = vsel %vm1947_vm10, %v1950_v23, %v1953_v11  ;;  %v2068_v25 = vshrl.u32 %v2050_v9, %v2066_v5  ;;  %v2071_v40 = vadd.s32 127, %v2070_v30 }
 0x26b   : > { %v1955_v6 = vsel %vm1944_vm9, nan, %v1954_v18 }
 0x26c   : > { %v2069_v14 = vor.u32 %v2068_v25, %v2067_v24  ;;  %v2072_v57 = vshll.u32 %v2071_v40, 23  ;;  %v2113_v35 = vrot.slane %v1955_v6, 2 }
 0x26e   : > { %v2073_v3 = vor.u32 4788187, %v2072_v57  ;;  %2117 = vst [vmem:[%s2878_s29 + $0x30] sm:$0xc0] %v2113_v35  ;;  %v2076_v43 = vcvt.s32.f32 %v2069_v14 }
 0x26f   : > { %2119 = vst [vmem:[%s2878_s29 + $0x40] sm:$0xf] %v2113_v35 }
 0x270   : > { %v2074_v41 = vand.u32 2147483647, %v2073_v3 }
 0x272   : > { %v2077_v60 = vmul.f32 %v2076_v43, %v2074_v41 }
 0x274   : > { %v2078_v0 = vxor.u32 2147483648, %v2077_v60 }
 0x276   : > { %v2079_v39 = vsel %vm1958_vm11, %v2078_v0, %v2077_v60 }
 0x277   : > { %v2082_v58 = vsel %vm1957_vm13, %v3675_v42, %v2079_v39 }
 0x278   : > { %v2084_v53 = vmul.f32 %v2082_v58, %v2082_v58 }
 0x27a   : > { %v2085_v2 = vmul.f32 -0.001358992, %v2084_v53  ;;  %v2092_v38 = vmul.f32 -0.00019511016, %v2084_v53 }
 0x27c   : > { %v2086_v49 = vadd.f32 0.041655596, %v2085_v2  ;;  %v2093_v31 = vadd.f32 0.008332121, %v2092_v38 }
 0x27e   : > { %v2087_v33 = vmul.f32 %v2086_v49, %v2084_v53  ;;  %v2094_v56 = vmul.f32 %v2093_v31, %v2084_v53 }
 0x280   : > { %v2088_v1 = vadd.f32 -0.4999988, %v2087_v33  ;;  %v2095_v51 = vadd.f32 -0.16666654, %v2094_v56 }
 0x282   : > { %v2089_v44 = vmul.f32 %v2088_v1, %v2084_v53  ;;  %v2096_v52 = vmul.f32 %v2095_v51, %v2084_v53 }
 0x284   : > { %v2090_v36 = vadd.f32 1.0, %v2089_v44  ;;  %v2097_v62 = vadd.f32 1.0, %v2096_v52 }
 0x286   : > { %v2098_v54 = vmul.f32 %v2097_v62, %v2082_v58  ;;  %v2107_v61 = vxor.u32 2147483648, %v2090_v36 }
 0x288   : > { %v2104_v48 = vxor.u32 2147483648, %v2098_v54  ;;  %v2108_v46 = vsel %vm2106_vm14, %v2107_v61, %v2098_v54 }
 0x28a   : > { %v2105_v45 = vsel %vm2103_vm12, %v2090_v36, %v2104_v48 }
 0x28b   : > { %v2109_v20 = vsel %vm2102_vm15, %v2105_v45, %v2108_v46 }
 0x28c   : > { %v2110_v16 = vsel %vm2099_vm1, nan, %v2109_v20 }
 0x28d   : > { %v2114_v37 = vrot.slane %v2110_v16, 2 }
 0x28f   : > { %2118 = vst [vmem:[%s2878_s29 + $0x38] sm:$0xc0] %v2114_v37 }
 0x290   : > { %2120 = vst [vmem:[%s2878_s29 + $0x48] sm:$0xf] %v2114_v37 }
 0x291   : > { %2391 = shalt.err (!%p2388_p4)
}
 0x292   : > { %s2439_s23 = smov 256   ;;  %s2440_s26 = smov 512  }
 0x293   : > { %s2441_s27 = smov 16  }
 0x294   : > { %2276 = dma.vmem_to_hbm [thread:$0]  (%p2507_p11), %s2140_s6, 1280, %s2142_s7, %s2127_s13, %s2439_s23, %s2440_s26, %s2441_s27  }
 0x295 PF: > { %s2156_s28 = sand.u32 1, %s2418_s9   ;;  %p3995_p7 = scmp.ge.s32.totalorder %s2430_s12, 2 }
 0x296   : > { %s2157_s20 = scalar_lea.sflag [#allocation4], %s2156_s28 }
 0x297   : > { %p2283_p5 = pnand %p3995_p7, %p2511_p12 }
 0x299   : > { %p2284_p8 = pneg %p2283_p5 }
 0x29b   : > { %2413 = dma.done.wait (%p2284_p8), %s2157_s20, 1280  }
 0x29c   : > { %2415 = vsyncadd (%p2284_p8), %s2157_s20, 4294966016  ;;  %p15_p10 = scmp.ge.s32.totalorder %s2482_s15, 4   ;;  %s3996_s9 = smov %s2422_s10 }
 0x29d   : > { %s3997_s10 = smov %s2426_s11  ;;  %s3998_s11 = smov %s2494_s18 }
 0x29e   : > { %s3999_s12 = smov %s2482_s15  ;;  %17 = sbr.rel (!%p15_p10) target bundleno = 5 (0x5), region = 78 }
 0x2a3   :  { %2163 = vsyncpa [#allocation3], 1 }
 0x2a4   :  { %2165 = vsyncpa [#allocation3 + $0x1], 1 }
 0x2a5   :  { %2166 = vsyncpa [#allocation4], 1 }
 0x2a6   :  { %2168 = vsyncpa [#allocation4 + $0x1], 1 }

</bundles_post_ra>
